<compile_context>
chip_gen: v5e
topology: v5e:2x2
jax: 0.10.0
libtpu: 0.0.40
codegen_flags: <defaults>
</compile_context>

<pallas_src>
import jax
import jax.numpy as jnp
from jax.experimental import pallas as pl
from jax.experimental.pallas import tpu as pltpu

IN_FEATURES = 224
HIDDEN = 1000
HIDDEN_PAD = 1024      # 1000 -> multiple of 128 (lane-dense weight/output tiles)
B_PAD = 8              # batch 1 -> f32 sublane tile


def _pick_tile_n():
    """Lane-tile of the fc output.  v7x (2 TensorCores): 4 parallel tiles so the
    megacore split streams half of the fc weight per core.  Single-TC v5e/v6e:
    2 bigger tiles -> fewer grid steps, less fixed per-step overhead."""
    try:
        kind = jax.devices()[0].device_kind.lower()
    except Exception:
        kind = ""
    return 256 if "v7" in kind else 512


def _fused_kernel(x_ref, w1t_ref, w2t_ref, b2_ref, o_ref):
    # x_ref:   (B_PAD, 224)  bf16      resident across the N grid
    # w1t_ref: (224, 1024)   bf16      resident across the N grid
    # w2t_ref: (1024, TILE_N) bf16     contiguous slab j, double-buffered
    # b2_ref:  (1, 1024)     f32       resident; sliced per tile in-kernel
    # o_ref:   (B_PAD, TILE_N) f32     output tile j
    tile_n = o_ref.shape[1]

    # v1 = x @ W1^T (no bias); v3 = relu(v1 - 1).  Recomputed per tile (it is
    # ~1.8 MFLOP, noise next to the W2-slab DMA) so the grid axis can be
    # "parallel" on megacore without a cross-iteration scratch dependency.
    v1 = jnp.dot(x_ref[...], w1t_ref[...], preferred_element_type=jnp.float32)
    v3 = jnp.maximum(v1 - 1.0, 0.0).astype(jnp.bfloat16)

    # TODO(synk): reference applies self.linear(v3) again here (shape-invalid:
    #             1000-wide input into a 224-in-features layer); skipped.

    col = pl.multiple_of(pl.program_id(0) * tile_n, 128)
    b_tile = b2_ref[:, pl.ds(col, tile_n)]
    o_ref[...] = (jnp.dot(v3, w2t_ref[...], preferred_element_type=jnp.float32)
                  + b_tile).astype(o_ref.dtype)


def prepare_params(w1, w2, b2, tile_n):
    """One-time weight prep: transpose, zero-pad, cast to bf16, and pre-split
    the fc weight into contiguous per-grid-step slabs.

    w1: (1000, 224), w2: (1000, 1000), b2: (1000,)
    Returns:
      w1t:  (224, 1024)               bf16
      w2t:  (n_tiles, 1024, tile_n)   bf16, slab j == W2^T[:, j*tile_n:(j+1)*tile_n]
      b2p:  (1, 1024)                 f32
    """
    n_tiles = HIDDEN_PAD // tile_n
    w1t = (jnp.zeros((IN_FEATURES, HIDDEN_PAD), jnp.float32)
           .at[:, :HIDDEN].set(w1.T).astype(jnp.bfloat16))
    w2t_full = (jnp.zeros((HIDDEN_PAD, HIDDEN_PAD), jnp.float32)
                .at[:HIDDEN, :HIDDEN].set(w2.T).astype(jnp.bfloat16))
    # (1024, n_tiles, tile_n) -> (n_tiles, 1024, tile_n); each slab is a
    # contiguous 2-D array in HBM (one straight-line DMA per grid step).
    w2t = w2t_full.reshape(HIDDEN_PAD, n_tiles, tile_n).transpose(1, 0, 2)
    b2p = (jnp.zeros((1, HIDDEN_PAD), jnp.float32)
           .at[:, :HIDDEN].set(b2.reshape(1, HIDDEN)))
    return w1t, w2t, b2p


@jax.jit
def model_forward(x, w1t, w2t, b2p):
    """x: (B, 224) f32; w1t/w2t/b2p: pre-padded params from prepare_params."""
    B = x.shape[0]
    n_tiles, _, tile_n = w2t.shape

    x_pad = (jnp.zeros((B_PAD, IN_FEATURES), jnp.bfloat16)
             .at[:B].set(x.astype(jnp.bfloat16)))

    flops = (2 * B_PAD * IN_FEATURES * HIDDEN_PAD * n_tiles   # recomputed 1st matmul
             + 2 * B_PAD * HIDDEN_PAD * HIDDEN_PAD)           # 2nd matmul
    bytes_accessed = (2 * (x_pad.size + w1t.size + w2t.size)          # bf16
                      + 4 * (b2p.size + B_PAD * HIDDEN_PAD))          # f32

    out_pad = pl.pallas_call(
        _fused_kernel,
        out_shape=jax.ShapeDtypeStruct((B_PAD, HIDDEN_PAD), jnp.float32),
        grid=(n_tiles,),
        in_specs=[
            pl.BlockSpec((B_PAD, IN_FEATURES), lambda j: (0, 0)),        # resident
            pl.BlockSpec((IN_FEATURES, HIDDEN_PAD), lambda j: (0, 0)),   # resident
            pl.BlockSpec((None, HIDDEN_PAD, tile_n), lambda j: (j, 0, 0)),  # streamed slab
            pl.BlockSpec((1, HIDDEN_PAD), lambda j: (0, 0)),             # resident bias
        ],
        out_specs=pl.BlockSpec((B_PAD, tile_n), lambda j: (0, j)),
        compiler_params=pltpu.CompilerParams(
            dimension_semantics=("parallel",),
            vmem_limit_bytes=32 << 20,
        ),
        cost_estimate=pl.CostEstimate(flops=flops,
                                      bytes_accessed=bytes_accessed,
                                      transcendentals=0),
    )(x_pad, w1t, w2t, b2p)

    return out_pad[:B, :HIDDEN]


def reference_forward_f32(x, w1, w2, b2):
    v1 = x @ w1.T
    v3 = jnp.maximum(v1 - 1.0, 0.0)
    return v3 @ w2.T + b2


def reference_forward_bf16(x, w1, w2, b2):
    """Same math with the kernel's bf16 operand / f32 accumulate recipe."""
    xb = x.astype(jnp.bfloat16)
    w1b = w1.astype(jnp.bfloat16)
    w2b = w2.astype(jnp.bfloat16)
    v1 = jnp.dot(xb, w1b.T, preferred_element_type=jnp.float32)
    v3 = jnp.maximum(v1 - 1.0, 0.0).astype(jnp.bfloat16)
    return jnp.dot(v3, w2b.T, preferred_element_type=jnp.float32) + b2


if __name__ == "__main__":
    key = jax.random.PRNGKey(0)
    k_x, k_w1, k_w2, k_b2 = jax.random.split(key, 4)

    # Deterministic parameter init (uniform, roughly matching nn.Linear scale).
    x = jax.random.normal(k_x, (1, IN_FEATURES), dtype=jnp.float32)
    bound1 = 1.0 / (IN_FEATURES ** 0.5)
    w1 = jax.random.uniform(k_w1, (HIDDEN, IN_FEATURES), jnp.float32,
                            minval=-bound1, maxval=bound1)
    bound2 = 1.0 / (HIDDEN ** 0.5)
    w2 = jax.random.uniform(k_w2, (HIDDEN, HIDDEN), jnp.float32,
                            minval=-bound2, maxval=bound2)
    b2 = jax.random.uniform(k_b2, (HIDDEN,), jnp.float32,
                            minval=-bound2, maxval=bound2)

    # One-time weight prep (transpose + pad + bf16 + slab split) off the hot path.
    tile_n = _pick_tile_n()
    w1t, w2t, b2p = prepare_params(w1, w2, b2, tile_n)
    w1t, w2t, b2p = jax.block_until_ready((w1t, w2t, b2p))

    out = jax.block_until_ready(model_forward(x, w1t, w2t, b2p))
    assert out.shape == (1, HIDDEN)

    # Tight check vs. a reference that uses the same bf16-operand recipe.
    ref_bf16 = reference_forward_bf16(x, w1, w2, b2)
    assert jnp.allclose(out, ref_bf16, atol=1e-3, rtol=1e-3)
    # Loose check vs. the full-f32 reference (bf16 weight streaming error).
    ref_f32 = reference_forward_f32(x, w1, w2, b2)
    assert jnp.allclose(out, ref_f32, atol=1e-2, rtol=1e-2)

    print("KERNEL_OK")
</pallas_src>

<mosaic_0001>
module attributes {stable_mosaic.version = 11 : i64} {
  func.func @_fused_kernel(%arg0: i32, %arg1: memref<8x224xbf16, #tpu.memory_space<vmem>>, %arg2: memref<224x1024xbf16, #tpu.memory_space<vmem>>, %arg3: memref<1x1024x512xbf16, #tpu.memory_space<vmem>>, %arg4: memref<1x1024xf32, #tpu.memory_space<vmem>>, %arg5: memref<8x512xf32, #tpu.memory_space<vmem>>) attributes {dimension_semantics = [#tpu.dimension_semantics<parallel>], iteration_bounds = array<i64: 2>, scalar_prefetch = 0 : i64, scratch_operands = 0 : i64, tpu.core_type = #tpu.core_type<tc>, window_params = [{pipeline_mode = #tpu.pipeline_mode<synchronous>, transform_indices = @transform_0, window_bounds = array<i64: 8, 224>}, {pipeline_mode = #tpu.pipeline_mode<synchronous>, transform_indices = @transform_1, window_bounds = array<i64: 224, 1024>}, {transform_indices = @transform_2, window_bounds = array<i64: 1, 1024, 512>}, {pipeline_mode = #tpu.pipeline_mode<synchronous>, transform_indices = @transform_3, window_bounds = array<i64: 1, 1024>}, {transform_indices = @transform_4, window_bounds = array<i64: 8, 512>}]} {
    %c0 = arith.constant 0 : index
    %c0_0 = arith.constant 0 : index
    %0 = vector.load %arg1[%c0, %c0_0] : memref<8x224xbf16, #tpu.memory_space<vmem>>, vector<8x224xbf16>
    %c0_1 = arith.constant 0 : index
    %c0_2 = arith.constant 0 : index
    %1 = vector.load %arg2[%c0_1, %c0_2] : memref<224x1024xbf16, #tpu.memory_space<vmem>>, vector<224x1024xbf16>
    %cst = arith.constant dense<0.000000e+00> : vector<8x1024xf32>
    %2 = tpu.matmul %0, %1, %cst {dimension_numbers = #tpu.dot_dimension_numbers<[1], [0], [0], [1], [0, 0, 1, 1], [], []>} : vector<8x224xbf16>, vector<224x1024xbf16>, vector<8x1024xf32> -> vector<8x1024xf32>
    %cst_3 = arith.constant 1.000000e+00 : f32
    %3 = vector.broadcast %cst_3 : f32 to vector<8x1024xf32>
    %4 = arith.subf %2, %3 : vector<8x1024xf32>
    %cst_4 = arith.constant 0.000000e+00 : f32
    %5 = vector.broadcast %cst_4 : f32 to vector<8x1024xf32>
    %6 = arith.maximumf %4, %5 : vector<8x1024xf32>
    %7 = arith.truncf %6 : vector<8x1024xf32> to vector<8x1024xbf16>
    %c512_i32 = arith.constant 512 : i32
    %8 = arith.muli %arg0, %c512_i32 : i32
    %9 = tpu.assume_multiple %8, 128 : i32
    %c0_5 = arith.constant 0 : index
    %10 = arith.index_cast %9 : i32 to index
    %11 = vector.load %arg4[%c0_5, %10] : memref<1x1024xf32, #tpu.memory_space<vmem>>, vector<1x512xf32>
    %c0_6 = arith.constant 0 : index
    %c0_7 = arith.constant 0 : index
    %c0_8 = arith.constant 0 : index
    %12 = vector.load %arg3[%c0_6, %c0_7, %c0_8] : memref<1x1024x512xbf16, #tpu.memory_space<vmem>>, vector<1x1024x512xbf16>
    %13 = vector.shape_cast %12 : vector<1x1024x512xbf16> to vector<1024x512xbf16>
    %cst_9 = arith.constant dense<0.000000e+00> : vector<8x512xf32>
    %14 = tpu.matmul %7, %13, %cst_9 {dimension_numbers = #tpu.dot_dimension_numbers<[1], [0], [0], [1], [0, 0, 1, 1], [], []>} : vector<8x1024xbf16>, vector<1024x512xbf16>, vector<8x512xf32> -> vector<8x512xf32>
    %15 = vector.broadcast %11 : vector<1x512xf32> to vector<8x512xf32>
    %16 = arith.addf %14, %15 : vector<8x512xf32>
    %c0_10 = arith.constant 0 : index
    %c0_11 = arith.constant 0 : index
    %17 = vector.load %arg5[%c0_10, %c0_11] : memref<8x512xf32, #tpu.memory_space<vmem>>, vector<8x512xf32>
    tpu.vector_store %arg5[%c0_10, %c0_11], %16 {strides = array<i32>} : memref<8x512xf32, #tpu.memory_space<vmem>>, vector<8x512xf32>,
    return
  }
  func.func @transform_0(%arg0: i32) -> (i32, i32) {
    %c0_i32 = arith.constant 0 : i32
    %c0_i32_0 = arith.constant 0 : i32
    %c0_i32_1 = arith.constant 0 : i32
    return %c0_i32, %c0_i32_0 : i32, i32
  }
  func.func @transform_1(%arg0: i32) -> (i32, i32) {
    %c0_i32 = arith.constant 0 : i32
    %c0_i32_0 = arith.constant 0 : i32
    %c0_i32_1 = arith.constant 0 : i32
    return %c0_i32, %c0_i32_0 : i32, i32
  }
  func.func @transform_2(%arg0: i32) -> (i32, i32, i32) {
    %c0_i32 = arith.constant 0 : i32
    %c0_i32_0 = arith.constant 0 : i32
    %c0_i32_1 = arith.constant 0 : i32
    return %arg0, %c0_i32, %c0_i32_0 : i32, i32, i32
  }
  func.func @transform_3(%arg0: i32) -> (i32, i32) {
    %c0_i32 = arith.constant 0 : i32
    %c0_i32_0 = arith.constant 0 : i32
    %c0_i32_1 = arith.constant 0 : i32
    return %c0_i32, %c0_i32_0 : i32, i32
  }
  func.func @transform_4(%arg0: i32) -> (i32, i32) {
    %c0_i32 = arith.constant 0 : i32
    %c0_i32_0 = arith.constant 0 : i32
    return %c0_i32, %arg0 : i32, i32
  }
}

</mosaic_0001>

<bundles_post_ra>
// kernel: model_forward.1
= control target key start
LH: loop header
LB: loop body
LE: loop exit
PB: predicated region body
PF: predicated region fallthrough
CT: control target
= control target key end

     0   :  { %9 = vsyncpa [#allocation3], 0  ;;  %s6091_s0 = inlined_call_operand.vmem [shape: bf16[8,224], index: 0, kind: input, shape index: {}]   ;;  %s6092_s1 = inlined_call_operand.hbm [shape: bf16[224,1024], index: 1, kind: input, shape index: {}]   ;;  %s6093_s2 = inlined_call_operand.hbm [shape: bf16[2,1024,512], index: 2, kind: input, shape index: {}]   ;;  %s6094_s3 = inlined_call_operand.hbm [shape: f32[1,1024], index: 3, kind: input, shape index: {}]   ;;  %s6095_s4 = inlined_call_operand.vmem [shape: f32[8,1024], index: 4, kind: output, shape index: {}]  }
   0x1   :  { %10 = vsyncpa [#allocation5], 0 }
   0x2   :  { %12 = vsyncpa [#allocation5 + $0x1], 0  ;;  %s5331_s15 = smov 0   ;;  %s5333_s16 = smov 0  }
   0x3   :  { %s5335_s17 = smov 0   ;;  %s5337_s18 = smov 0  }
   0x4 LB: > { %s5350_s19 = sadd.s32 4294967295, %s5298_s18   ;;  %s5353_s20 = sadd.s32 1, %s5298_s18   ;;  %s5298_s18 = sphi %s5337_s18, %s6104_s18   ;;  %s5294_s17 = sphi %s5335_s17, %s6103_s17   ;;  %s5290_s16 = sphi %s5333_s16, %s6102_s16   ;;  %s5286_s15 = sphi %s5331_s15, %s6101_s15  }
   0x5   : > { %s64_s21 = ssub.s32 %s5298_s18, %s5353_s20  ;;  %s67_s22 = sadd.s32 1, %s5294_s17 }
   0x6   : > { %p65_p0 = scmp.eq.s32.totalorder %s64_s21, 0  ;;  %p74_p1 = scmp.ne.s32.totalorder %s5294_s17, %s5290_s16 }
   0x7   : > { %p75_p2 = scmp.eq.s32.totalorder %s5298_s18, 0  ;;  %p80_p3 = scmp.ne.s32.totalorder %s5290_s16, %s5286_s15 }
   0x8   : > { %s5363_s23 = scalar_select %p65_p0, %s5294_s17, %s67_s22  }
   0x9   : > { %p5365_p4 = por %p75_p2, %p74_p1  ;;  %p81_p5 = scmp.eq.s32.totalorder %s5350_s19, 0 }
   0xa   : > { %p3229_p6 = scmp.ge.s32.totalorder %s5298_s18, 1  ;;  %p138_p7 = scmp.lt.s32.totalorder %s5298_s18, 3 }
   0xb   : > { %p5374_p8 = por %p81_p5, %p80_p3  ;;  %s167_s29 = sshll.u32 %s6094_s3, 4  ;;  %s168_s29 = int_to_ptr.hbm [resolvable:$true] %s167_s29 }
   0xc   : > { %p5378_p9 = pnand %p3229_p6, %p138_p7  ;;  %s5300_s30 = smov [#allocation6]  }
   0xd   : > { %s169_s5 = sshll.u32 %s5300_s30, 4  ;;  %p5125_p12 = scmp.lt.s32.totalorder %s5298_s18, 2  ;;  %s170_s5 = int_to_ptr.vmem [resolvable:$true] %s169_s5 }
   0xe   : > { %p5112_p10 = pneg %p5378_p9  ;;  %s152_s8 = sshll.u32 %s6092_s1, 4  ;;  %s153_s8 = int_to_ptr.hbm [resolvable:$true] %s152_s8 }
   0xf   : > { %p5395_p13 = pnand %p5125_p12, %p5365_p4  ;;  %s5301_s10 = smov [#allocation2]  }
  0x10   : > { %p5113_p11 = pnand %p5112_p10, %p81_p5  ;;  %s154_s11 = sshll.u32 %s5301_s10, 4  ;;  %s155_s11 = int_to_ptr.vmem [resolvable:$true] %s154_s11 }
  0x11   : > { %s5302_s12 = smov 512   ;;  %s5303_s13 = smov 32  }
  0x12   : > { %5118 = dma.hbm_to_vmem [thread:$0]  (!%p5113_p11), %s168_s29, 128, %s170_s5, [#allocation5]  }
  0x13   : > { %5115 = dma.hbm_to_vmem [thread:$0]  (!%p5113_p11), %s153_s8, 14336, %s155_s11, [#allocation3], %s5302_s12, %s5302_s12, %s5303_s13  }
  0x14   : > { %s180_s14 = sand.u32 1, %s5298_s18   ;;  %s182_s15 = sand.u32 1, %s5294_s17  }
  0x15   : > { %s3233_s21 = sshll.u32 %s182_s15, 11  ;;  %s4733_s22 = sshll.u32 %s5298_s18, 11 }
  0x16   : > { %s189_s24 = scalar_lea.hbm %s6093_s2, %s4733_s22  ;;  %s184_s30 = scalar_lea.vmem [#allocation4], %s3233_s21 }
  0x17   : > { %s192_s6 = sshll.u32 %s184_s30, 4  ;;  %s190_s7 = sshll.u32 %s189_s24, 4  ;;  %s193_s6 = int_to_ptr.vmem [resolvable:$true] %s192_s6  ;;  %s191_s7 = int_to_ptr.hbm [resolvable:$true] %s190_s7 }
  0x18   : > { %s181_s29 = scalar_lea.sflag [#allocation5], %s180_s14  ;;  %s5226_s5 = sshra.s32 %s191_s7, 4  ;;  %s5227_s5 = int_to_ptr.hbm [resolvable:$true] %s5226_s5 }
  0x19   : > { %s5228_s10 = scalar_lea.hbm %s5227_s5, 2048  ;;  %p5230_p1 = pneg %p5395_p13 }
  0x1a   : > { %p5229_p0 = scmp.ne.s32.totalorder %s5227_s5, %s5228_s10  ;;  %s5233_s11 = scalar_lea.hbm %s6093_s2, 4096 }
  0x1b   : > { %p5234_p4 = scmp.lt.s32.totalorder %s5227_s5, %s6093_s2  ;;  %p5235_p6 = scmp.lt.s32.totalorder %s5233_s11, %s5228_s10 }
  0x1c   : > { %p5231_p2 = pnand %p5230_p1, %p5229_p0 }
  0x1d   : > { %p5236_p7 = por %p5235_p6, %p5234_p4 }
  0x1e   : > { %p5232_p3 = pneg %p5231_p2 }
  0x20   : > { %p5237_p10 = pnand %p5236_p7, %p5232_p3 }
  0x22   : > { %5240 = shalt.err (!%p5237_p10)
}
  0x23   : > { %s5304_s14 = smov 256   ;;  %s5305_s15 = smov 16  }
  0x24   : > { %5122 = dma.hbm_to_vmem [thread:$0]  (!%p5395_p13), %s191_s7, 32768, %s193_s6, %s181_s29, %s5304_s14, %s5304_s14, %s5305_s15  }
  0x25   : > { %204 = sbr.rel (%p5378_p9) target bundleno = 600 (0x258), region = 36 }
  0x2a   : > { %5273 = dma.done.wait (%p81_p5), [#allocation3], 14336  }
  0x2b   : > { %5275 = vsyncadd (%p81_p5), [#allocation3], 4294952960  ;;  %s211_s21 = sand.u32 1, %s5350_s19   ;;  %s213_s22 = sand.u32 1, %s5290_s16  }
  0x2c   : > { %s3238_s27 = sshll.u32 %s213_s22, 11  ;;  %s212_s28 = scalar_lea.sflag [#allocation5], %s211_s21 }
  0x2d   : > { %s5423_s24 = scalar_lea.vmem [#allocation4], %s3238_s27 }
  0x2e   : > { %5277 = dma.done.wait (%p5374_p8), %s212_s28, 32768  }
  0x2f   : > { %5279 = vsyncadd (%p5374_p8), %s212_s28, 4294934528 }
  0x30   : > { %5281 = dma.done.wait (%p81_p5), [#allocation5], 128  }
  0x31   : > { %5283 = vsyncadd (%p81_p5), [#allocation5], 4294967168  ;;  %v3468_v0 = vld [vmem:[#allocation2 + $0x1c0] sm:$0xf]  ;;  %v4790_v5 = vld [vmem:[#allocation2 + $0x1c4] sm:$0xf] }
  0x32   : > { %v4794_v1 = vld [vmem:[#allocation2 + $0x1dc] sm:$0xf0]  ;;  %v3470_v6 = vld [vmem:[#allocation2 + $0x1e0] sm:$0xf0]  ;;  %vm932_vm0 = vcmask 785408   ;;  %s3706_s9 = sshll.u32 %s5350_s19, 9 }
  0x33   : > { %v3660_v2 = vld [vmem:[#allocation2 + $0x340] sm:$0xf]  ;;  %v3469_v3 = vor.u32 %v4794_v1, %v3468_v0  ;;  %v3473_v8 = vor.u32 %v4790_v5, %v3470_v6  ;;  %v4838_v9 = vld [vmem:[#allocation2 + $0x344] sm:$0xf]  ;;  %v4795_v5 = vld [vmem:[#allocation2 + $0x1e4] sm:$0xf0] }
  0x34   : > { %v4842_v4 = vld [vmem:[#allocation2 + $0x35c] sm:$0xf0]  ;;  %v3662_v10 = vld [vmem:[#allocation2 + $0x360] sm:$0xf0]  ;;  %s5940_s30 = sshra.s32 %s3706_s9, 7  ;;  %s3240_s7 = sshll.u32 %s5350_s19, 2 }
  0x35   : > { %v3661_v7 = vor.u32 %v4842_v4, %v3660_v2  ;;  %v3436_v11 = vld [vmem:[#allocation2 + $0x180] sm:$0xf]  ;;  %936 = vmatpush.bf16.msra.mxu0 %v3469_v3  ;;  %v3665_v12 = vor.u32 %v4838_v9, %v3662_v10  ;;  %962 = vmatpush.bf16.msra.mxu2 %v3473_v8  ;;  %v4782_v18 = vld [vmem:[#allocation2 + $0x184] sm:$0xf]  ;;  %v3476_v4 = vld [vmem:[#allocation2 + $0x1c8] sm:$0xf] }
  0x36   : > { %v4786_v13 = vld [vmem:[#allocation2 + $0x19c] sm:$0xf0]  ;;  %v3438_v19 = vld [vmem:[#allocation2 + $0x1a0] sm:$0xf0]  ;;  %v4843_v8 = vld [vmem:[#allocation2 + $0x364] sm:$0xf0] }
  0x37   : > { %v3628_v14 = vld [vmem:[#allocation2 + $0x300] sm:$0xf]  ;;  %951 = vmatpush.bf16.msra.mxu1 %v3661_v7  ;;  %v3437_v16 = vor.u32 %v4786_v13, %v3436_v11  ;;  %v4830_v20 = vld [vmem:[#allocation2 + $0x304] sm:$0xf]  ;;  %977 = vmatpush.bf16.msra.mxu3 %v3665_v12  ;;  %v3441_v21 = vor.u32 %v4782_v18, %v3438_v19  ;;  %v3668_v7 = vld [vmem:[#allocation2 + $0x348] sm:$0xf] }
  0x38   : > { %v4834_v15 = vld [vmem:[#allocation2 + $0x31c] sm:$0xf0]  ;;  %v3630_v22 = vld [vmem:[#allocation2 + $0x320] sm:$0xf0]  ;;  %v3669_v18 = vor.u32 %v4843_v8, %v3668_v7  ;;  %v4787_v19 = vld [vmem:[#allocation2 + $0x1a4] sm:$0xf0] }
  0x39   : > { %v3629_v17 = vor.u32 %v4834_v15, %v3628_v14  ;;  %v3404_v23 = vld [vmem:[#allocation2 + $0x140] sm:$0xf]  ;;  %v3633_v25 = vor.u32 %v4830_v20, %v3630_v22  ;;  %v4774_v28 = vld [vmem:[#allocation2 + $0x144] sm:$0xf]  ;;  %937 = vmatpush.bf16.msra.mxu0 %v3437_v16  ;;  %963 = vmatpush.bf16.msra.mxu2 %v3441_v21  ;;  %v3477_v14 = vor.u32 %v4795_v5, %v3476_v4  ;;  %v3636_v20 = vld [vmem:[#allocation2 + $0x308] sm:$0xf] }
  0x3a   : > { %v4778_v24 = vld [vmem:[#allocation2 + $0x15c] sm:$0xf0]  ;;  %v3406_v30 = vld [vmem:[#allocation2 + $0x160] sm:$0xf0]  ;;  %v4835_v21 = vld [vmem:[#allocation2 + $0x324] sm:$0xf0] }
  0x3b   : > { %v3596_v26 = vld [vmem:[#allocation2 + $0x2c0] sm:$0xf]  ;;  %v3405_v29 = vor.u32 %v4778_v24, %v3404_v23  ;;  %v4822_v31 = vld [vmem:[#allocation2 + $0x2c4] sm:$0xf]  ;;  %952 = vmatpush.bf16.msra.mxu1 %v3629_v17  ;;  %v3409_v34 = vor.u32 %v4774_v28, %v3406_v30  ;;  %978 = vmatpush.bf16.msra.mxu3 %v3633_v25  ;;  %v3444_v17 = vld [vmem:[#allocation2 + $0x188] sm:$0xf] }
  0x3c   : > { %v4826_v27 = vld [vmem:[#allocation2 + $0x2dc] sm:$0xf0]  ;;  %v3598_v32 = vld [vmem:[#allocation2 + $0x2e0] sm:$0xf0]  ;;  %v3412_v28 = vld [vmem:[#allocation2 + $0x148] sm:$0xf]  ;;  %v3445_v30 = vor.u32 %v4787_v19, %v3444_v17 }
  0x3d   : > { %v3597_v33 = vor.u32 %v4826_v27, %v3596_v26  ;;  %v3372_v35 = vld [vmem:[#allocation2 + $0x100] sm:$0xf]  ;;  %v3601_v38 = vor.u32 %v4822_v31, %v3598_v32  ;;  %v4766_v40 = vld [vmem:[#allocation2 + $0x104] sm:$0xf]  ;;  %938 = vmatpush.bf16.msra.mxu0 %v3405_v29  ;;  %964 = vmatpush.bf16.msra.mxu2 %v3409_v34  ;;  %v4779_v31 = vld [vmem:[#allocation2 + $0x164] sm:$0xf0] }
  0x3e   : > { %v4770_v36 = vld [vmem:[#allocation2 + $0x11c] sm:$0xf0]  ;;  %v3374_v41 = vld [vmem:[#allocation2 + $0x120] sm:$0xf0]  ;;  %v4791_v32 = vld [vmem:[#allocation2 + $0x1cc] sm:$0xf] }
  0x3f   : > { %v3564_v37 = vld [vmem:[#allocation2 + $0x280] sm:$0xf]  ;;  %v4814_v42 = vld [vmem:[#allocation2 + $0x284] sm:$0xf]  ;;  %v3373_v44 = vor.u32 %v4770_v36, %v3372_v35  ;;  %953 = vmatpush.bf16.msra.mxu1 %v3597_v33  ;;  %v3377_v46 = vor.u32 %v4766_v40, %v3374_v41  ;;  %979 = vmatpush.bf16.msra.mxu3 %v3601_v38  ;;  %v3478_v33 = vld [vmem:[#allocation2 + $0x1e8] sm:$0xf0]  ;;  %v3637_v35 = vor.u32 %v4835_v21, %v3636_v20 }
  0x40   : > { %v4818_v39 = vld [vmem:[#allocation2 + $0x29c] sm:$0xf0]  ;;  %v3566_v43 = vld [vmem:[#allocation2 + $0x2a0] sm:$0xf0]  ;;  %v4839_v36 = vld [vmem:[#allocation2 + $0x34c] sm:$0xf] }
  0x41   : > { %v3565_v45 = vor.u32 %v4818_v39, %v3564_v37  ;;  %v3340_v47 = vld [vmem:[#allocation2 + $0xc0] sm:$0xf]  ;;  %v3569_v50 = vor.u32 %v4814_v42, %v3566_v43  ;;  %v4758_v52 = vld [vmem:[#allocation2 + $0xc4] sm:$0xf]  ;;  %939 = vmatpush.bf16.msra.mxu0 %v3373_v44  ;;  %965 = vmatpush.bf16.msra.mxu2 %v3377_v46  ;;  %v3670_v37 = vld [vmem:[#allocation2 + $0x368] sm:$0xf0]  ;;  %v3481_v44 = vor.u32 %v4791_v32, %v3478_v33 }
  0x42   : > { %v4762_v48 = vld [vmem:[#allocation2 + $0xdc] sm:$0xf0]  ;;  %v3342_v53 = vld [vmem:[#allocation2 + $0xe0] sm:$0xf0]  ;;  %v3604_v39 = vld [vmem:[#allocation2 + $0x2c8] sm:$0xf]  ;;  %v3673_v46 = vor.u32 %v4839_v36, %v3670_v37 }
  0x43   : > { %v3532_v49 = vld [vmem:[#allocation2 + $0x240] sm:$0xf]  ;;  %v4806_v54 = vld [vmem:[#allocation2 + $0x244] sm:$0xf]  ;;  %v3341_v56 = vor.u32 %v4762_v48, %v3340_v47  ;;  %954 = vmatpush.bf16.msra.mxu1 %v3565_v45  ;;  %v3345_v59 = vor.u32 %v4758_v52, %v3342_v53  ;;  %980 = vmatpush.bf16.msra.mxu3 %v3569_v50  ;;  %v4827_v40 = vld [vmem:[#allocation2 + $0x2e4] sm:$0xf0]  ;;  %v3413_v45 = vor.u32 %v4779_v31, %v3412_v28 }
  0x44   : > { %v4810_v51 = vld [vmem:[#allocation2 + $0x25c] sm:$0xf0]  ;;  %v3534_v55 = vld [vmem:[#allocation2 + $0x260] sm:$0xf0]  ;;  %v3380_v47 = vld [vmem:[#allocation2 + $0x108] sm:$0xf]  ;;  %v3605_v50 = vor.u32 %v4827_v40, %v3604_v39 }
  0x45   : > { %v3308_v57 = vld [vmem:[#allocation2 + $0x80] sm:$0xf]  ;;  %v3533_v58 = vor.u32 %v4810_v51, %v3532_v49  ;;  %v3537_v63 = vor.u32 %v4806_v54, %v3534_v55  ;;  %v4750_v0 = vld [vmem:[#allocation2 + $0x84] sm:$0xf]  ;;  %940 = vmatpush.bf16.msra.mxu0 %v3341_v56  ;;  %966 = vmatpush.bf16.msra.mxu2 %v3345_v59  ;;  %v4783_v48 = vld [vmem:[#allocation2 + $0x18c] sm:$0xf] }
  0x46   : > { %v4754_v60 = vld [vmem:[#allocation2 + $0x9c] sm:$0xf0]  ;;  %v3310_v1 = vld [vmem:[#allocation2 + $0xa0] sm:$0xf0]  ;;  %v3446_v49 = vld [vmem:[#allocation2 + $0x1a8] sm:$0xf0] }
  0x47   : > { %v3500_v61 = vld [vmem:[#allocation2 + $0x200] sm:$0xf]  ;;  %v4798_v2 = vld [vmem:[#allocation2 + $0x204] sm:$0xf]  ;;  %v3309_v6 = vor.u32 %v4754_v60, %v3308_v57  ;;  %955 = vmatpush.bf16.msra.mxu1 %v3533_v58  ;;  %v3313_v10 = vor.u32 %v4750_v0, %v3310_v1  ;;  %981 = vmatpush.bf16.msra.mxu3 %v3537_v63  ;;  %v4771_v51 = vld [vmem:[#allocation2 + $0x124] sm:$0xf0]  ;;  %v3449_v57 = vor.u32 %v4783_v48, %v3446_v49 }
  0x48   : > { %v4802_v62 = vld [vmem:[#allocation2 + $0x21c] sm:$0xf0]  ;;  %v3502_v3 = vld [vmem:[#allocation2 + $0x220] sm:$0xf0]  ;;  %v4831_v52 = vld [vmem:[#allocation2 + $0x30c] sm:$0xf]  ;;  %v3381_v58 = vor.u32 %v4771_v51, %v3380_v47 }
  0x49   : > { %v3501_v9 = vor.u32 %v4802_v62, %v3500_v61  ;;  %v3276_v11 = vld [vmem:[#allocation2 + $0x40] sm:$0xf]  ;;  %v3505_v13 = vor.u32 %v4798_v2, %v3502_v3  ;;  %v4742_v15 = vld [vmem:[#allocation2 + $0x44] sm:$0xf]  ;;  %941 = vmatpush.bf16.msra.mxu0 %v3309_v6  ;;  %967 = vmatpush.bf16.msra.mxu2 %v3313_v10  ;;  %v3638_v53 = vld [vmem:[#allocation2 + $0x328] sm:$0xf0] }
  0x4a   : > { %v4746_v12 = vld [vmem:[#allocation2 + $0x5c] sm:$0xf0]  ;;  %v3278_v16 = vld [vmem:[#allocation2 + $0x60] sm:$0xf0]  ;;  %v3572_v54 = vld [vmem:[#allocation2 + $0x288] sm:$0xf]  ;;  %v3641_v59 = vor.u32 %v4831_v52, %v3638_v53 }
  0x4b   : > { %v3277_v22 = vor.u32 %v4746_v12, %v3276_v11  ;;  %v3244_v23 = vld [vmem:[#allocation2] sm:$0xf]  ;;  %v4734_v25 = vld [vmem:[#allocation2 + $0x4] sm:$0xf]  ;;  %956 = vmatpush.bf16.msra.mxu1 %v3501_v9  ;;  %v3281_v26 = vor.u32 %v4742_v15, %v3278_v16  ;;  %982 = vmatpush.bf16.msra.mxu3 %v3505_v13  ;;  %v4819_v55 = vld [vmem:[#allocation2 + $0x2a4] sm:$0xf0] }
  0x4c   : > { %v4738_v24 = vld [vmem:[#allocation2 + $0x1c] sm:$0xf0]  ;;  %v3246_v27 = vld [vmem:[#allocation2 + $0x20] sm:$0xf0]  ;;  %v3348_v60 = vld [vmem:[#allocation2 + $0xc8] sm:$0xf]  ;;  %v3573_v63 = vor.u32 %v4819_v55, %v3572_v54 }
  0x4d   : > { %v253_v29 = vld [vmem:[%s6091_s0] sm:$0xff]  ;;  %942 = vmatpush.bf16.msra.mxu0 %v3277_v22  ;;  %v3245_v38 = vor.u32 %v4738_v24, %v3244_v23  ;;  %968 = vmatpush.bf16.msra.mxu2 %v3281_v26  ;;  %v3249_v43 = vor.u32 %v4734_v25, %v3246_v27  ;;  %v4775_v61 = vld [vmem:[#allocation2 + $0x14c] sm:$0xf]  ;;  %v4763_v0 = vld [vmem:[#allocation2 + $0xe4] sm:$0xf0]  ;;  %s1171_s6 = scalar_lea.vmem [#allocation6], %s5940_s30 }
  0x4e   : > { %v368_v34 = vunpack.c.h.b16 %v253_v29  ;;  %v367_v42 = vunpack.c.l.b16 %v253_v29  ;;  %v3414_v62 = vld [vmem:[#allocation2 + $0x168] sm:$0xf0]  ;;  %v3540_v3 = vld [vmem:[#allocation2 + $0x248] sm:$0xf]  ;;  %v3349_v6 = vor.u32 %v4763_v0, %v3348_v60  ;;  %v4796_v19 = vld [vmem:[#allocation2 + $0x1ec] sm:$0xf0] }
  0x4f   : > { %988 = vmatpush.bf16.msrb.mxu1 %v3477_v14  ;;  %1003 = vmatpush.bf16.msrb.mxu3 %v3669_v18  ;;  %v4823_v1 = vld [vmem:[#allocation2 + $0x2cc] sm:$0xf]  ;;  %v4811_v4 = vld [vmem:[#allocation2 + $0x264] sm:$0xf0]  ;;  %v3417_v5 = vor.u32 %v4775_v61, %v3414_v62  ;;  %v3484_v18 = vld [vmem:[#allocation2 + $0x1d0] sm:$0xf] }
  0x50   : > { %v5436_v41 = vpack.c.b16 %v368_v34, %v368_v34  ;;  %v5442_v56 = vpack.c.b16 %v367_v42, %v367_v42  ;;  %v3606_v2 = vld [vmem:[#allocation2 + $0x2e8] sm:$0xf0]  ;;  %v3316_v8 = vld [vmem:[#allocation2 + $0x88] sm:$0xf]  ;;  %v3541_v11 = vor.u32 %v4811_v4, %v3540_v3  ;;  %v3485_v29 = vor.u32 %v4796_v19, %v3484_v18  ;;  %v3452_v31 = vld [vmem:[#allocation2 + $0x190] sm:$0xf] }
  0x51   : > { %943 = vmatpush.bf16.msra.mxu0 %v3245_v38  ;;  %969 = vmatpush.bf16.msra.mxu2 %v3249_v43  ;;  %v3609_v7 = vor.u32 %v4823_v1, %v3606_v2  ;;  %v4767_v9 = vld [vmem:[#allocation2 + $0x10c] sm:$0xf]  ;;  %v4755_v12 = vld [vmem:[#allocation2 + $0xa4] sm:$0xf0]  ;;  %v4788_v32 = vld [vmem:[#allocation2 + $0x1ac] sm:$0xf0] }
  0x52   : > { %3691 = vmatmul.msk.bf16.vlgmr.msra.gmra.mxu3 %vm932_vm0, %v5436_v41  ;;  %3690 = vmatmul.msk.bf16.vlgmr.msra.gmra.mxu1 %vm932_vm0, %v5436_v41  ;;  %v3382_v10 = vld [vmem:[#allocation2 + $0x128] sm:$0xf0]  ;;  %v3508_v15 = vld [vmem:[#allocation2 + $0x208] sm:$0xf]  ;;  %v3317_v20 = vor.u32 %v4755_v12, %v3316_v8  ;;  %v3676_v42 = vld [vmem:[#allocation2 + $0x350] sm:$0xf]  ;;  %v3453_v43 = vor.u32 %v4788_v32, %v3452_v31 }
  0x53   : > { %989 = vmatpush.bf16.msrb.mxu1 %v3445_v30  ;;  %1004 = vmatpush.bf16.msrb.mxu3 %v3637_v35  ;;  %v4815_v13 = vld [vmem:[#allocation2 + $0x28c] sm:$0xf]  ;;  %v4803_v16 = vld [vmem:[#allocation2 + $0x224] sm:$0xf0]  ;;  %v3385_v17 = vor.u32 %v4767_v9, %v3382_v10  ;;  %v3420_v48 = vld [vmem:[#allocation2 + $0x150] sm:$0xf] }
  0x54   : > { %944 = vmatmul.bf16.vlgmr.msra.gmra.mxu0 %v5442_v56  ;;  %970 = vmatmul.bf16.vlgmr.msra.gmra.mxu2 %v5442_v56  ;;  %v3574_v14 = vld [vmem:[#allocation2 + $0x2a8] sm:$0xf0]  ;;  %v3284_v22 = vld [vmem:[#allocation2 + $0x48] sm:$0xf]  ;;  %v3509_v25 = vor.u32 %v4803_v16, %v3508_v15  ;;  %v4780_v49 = vld [vmem:[#allocation2 + $0x16c] sm:$0xf0] }
  0x55   : > { %1014 = vmatpush.bf16.msrb.mxu0 %v3481_v44  ;;  %1029 = vmatpush.bf16.msrb.mxu2 %v3673_v46  ;;  %v3577_v21 = vor.u32 %v4815_v13, %v3574_v14  ;;  %v4759_v23 = vld [vmem:[#allocation2 + $0xcc] sm:$0xf]  ;;  %v4747_v26 = vld [vmem:[#allocation2 + $0x64] sm:$0xf0]  ;;  %v4844_v44 = vld [vmem:[#allocation2 + $0x36c] sm:$0xf0] }
  0x56   : > { %v3350_v24 = vld [vmem:[#allocation2 + $0xe8] sm:$0xf0]  ;;  %v3252_v33 = vld [vmem:[#allocation2 + $0x8] sm:$0xf]  ;;  %v3285_v34 = vor.u32 %v4747_v26, %v3284_v22  ;;  %v3486_v46 = vld [vmem:[#allocation2 + $0x1f0] sm:$0xf0]  ;;  %v3677_v54 = vor.u32 %v4844_v44, %v3676_v42 }
  0x57   : > { %990 = vmatpush.bf16.msrb.mxu1 %v3413_v45  ;;  %1005 = vmatpush.bf16.msrb.mxu3 %v3605_v50  ;;  %v4807_v27 = vld [vmem:[#allocation2 + $0x24c] sm:$0xf]  ;;  %v3353_v30 = vor.u32 %v4759_v23, %v3350_v24  ;;  %v4739_v36 = vld [vmem:[#allocation2 + $0x24] sm:$0xf0]  ;;  %v4792_v45 = vld [vmem:[#allocation2 + $0x1d4] sm:$0xf] }
  0x58   : > { %v3542_v28 = vld [vmem:[#allocation2 + $0x268] sm:$0xf0]  ;;  %v3253_v50 = vor.u32 %v4739_v36, %v3252_v33  ;;  %v3489_v55 = vor.u32 %v4792_v45, %v3486_v46  ;;  %v4784_v60 = vld [vmem:[#allocation2 + $0x194] sm:$0xf]  ;;  %v4772_v0 = vld [vmem:[#allocation2 + $0x12c] sm:$0xf0] }
  0x59   : > { %1015 = vmatpush.bf16.msrb.mxu0 %v3449_v57  ;;  %1030 = vmatpush.bf16.msrb.mxu2 %v3641_v59  ;;  %v3545_v35 = vor.u32 %v4807_v27, %v3542_v28  ;;  %v4751_v37 = vld [vmem:[#allocation2 + $0x8c] sm:$0xf]  ;;  %v3644_v57 = vld [vmem:[#allocation2 + $0x310] sm:$0xf]  ;;  %v3454_v61 = vld [vmem:[#allocation2 + $0x1b0] sm:$0xf0] }
  0x5a   : > { %v3318_v38 = vld [vmem:[#allocation2 + $0xa8] sm:$0xf0]  ;;  %v4836_v59 = vld [vmem:[#allocation2 + $0x32c] sm:$0xf0]  ;;  %v3457_v4 = vor.u32 %v4784_v60, %v3454_v61  ;;  %v4776_v10 = vld [vmem:[#allocation2 + $0x154] sm:$0xf] }
  0x5b   : > { %991 = vmatpush.bf16.msrb.mxu1 %v3381_v58  ;;  %1006 = vmatpush.bf16.msrb.mxu3 %v3573_v63  ;;  %v4799_v39 = vld [vmem:[#allocation2 + $0x20c] sm:$0xf]  ;;  %v3321_v47 = vor.u32 %v4751_v37, %v3318_v38  ;;  %v3421_v58 = vor.u32 %v4780_v49, %v3420_v48  ;;  %v3388_v63 = vld [vmem:[#allocation2 + $0x110] sm:$0xf]  ;;  %v3645_v3 = vor.u32 %v4836_v59, %v3644_v57  ;;  %v4832_v19 = vld [vmem:[#allocation2 + $0x314] sm:$0xf] }
  0x5c   : > { %v3510_v40 = vld [vmem:[#allocation2 + $0x228] sm:$0xf0]  ;;  %v3389_v8 = vor.u32 %v4772_v0, %v3388_v63  ;;  %v4828_v9 = vld [vmem:[#allocation2 + $0x2ec] sm:$0xf0]  ;;  %v4768_v23 = vld [vmem:[#allocation2 + $0x114] sm:$0xf] }
  0x5d   : > { %1016 = vmatpush.bf16.msrb.mxu0 %v3417_v5  ;;  %1031 = vmatpush.bf16.msrb.mxu2 %v3609_v7  ;;  %v3513_v51 = vor.u32 %v4799_v39, %v3510_v40  ;;  %v4743_v52 = vld [vmem:[#allocation2 + $0x4c] sm:$0xf]  ;;  %v3612_v5 = vld [vmem:[#allocation2 + $0x2d0] sm:$0xf]  ;;  %v3678_v7 = vld [vmem:[#allocation2 + $0x370] sm:$0xf0] }
  0x5e   : > { %v3286_v53 = vld [vmem:[#allocation2 + $0x68] sm:$0xf0]  ;;  %v3356_v13 = vld [vmem:[#allocation2 + $0xd0] sm:$0xf]  ;;  %v3613_v16 = vor.u32 %v4828_v9, %v3612_v5  ;;  %v3390_v24 = vld [vmem:[#allocation2 + $0x130] sm:$0xf0] }
  0x5f   : > { %992 = vmatpush.bf16.msrb.mxu1 %v3349_v6  ;;  %1007 = vmatpush.bf16.msrb.mxu3 %v3541_v11  ;;  %v3289_v62 = vor.u32 %v4743_v52, %v3286_v53  ;;  %v4735_v1 = vld [vmem:[#allocation2 + $0xc] sm:$0xf]  ;;  %v4840_v6 = vld [vmem:[#allocation2 + $0x354] sm:$0xf]  ;;  %v4764_v14 = vld [vmem:[#allocation2 + $0xec] sm:$0xf0] }
  0x60   : > { %v3254_v2 = vld [vmem:[#allocation2 + $0x28] sm:$0xf0]  ;;  %v3422_v11 = vld [vmem:[#allocation2 + $0x170] sm:$0xf0]  ;;  %v3681_v15 = vor.u32 %v4840_v6, %v3678_v7  ;;  %v3580_v18 = vld [vmem:[#allocation2 + $0x290] sm:$0xf] }
  0x61   : > { %1017 = vmatpush.bf16.msrb.mxu0 %v3385_v17  ;;  %1032 = vmatpush.bf16.msrb.mxu2 %v3577_v21  ;;  %v3257_v12 = vor.u32 %v4735_v1, %v3254_v2  ;;  %v3425_v17 = vor.u32 %v4776_v10, %v3422_v11  ;;  %v3357_v21 = vor.u32 %v4764_v14, %v3356_v13  ;;  %v4820_v22 = vld [vmem:[#allocation2 + $0x2ac] sm:$0xf0]  ;;  %v4824_v31 = vld [vmem:[#allocation2 + $0x2d4] sm:$0xf]  ;;  %v3492_v52 = vld [vmem:[#allocation2 + $0x1d8] sm:$0xf] }
  0x62   : > { %v4756_v26 = vld [vmem:[#allocation2 + $0xac] sm:$0xf0]  ;;  %v3581_v28 = vor.u32 %v4820_v22, %v3580_v18  ;;  %v3614_v32 = vld [vmem:[#allocation2 + $0x2f0] sm:$0xf0]  ;;  %v4797_v53 = vld [vmem:[#allocation2 + $0x1f4] sm:$0xf0] }
  0x63   : > { %993 = vmatpush.bf16.msrb.mxu1 %v3317_v20  ;;  %1008 = vmatpush.bf16.msrb.mxu3 %v3509_v25  ;;  %v3646_v20 = vld [vmem:[#allocation2 + $0x330] sm:$0xf0]  ;;  %v3324_v25 = vld [vmem:[#allocation2 + $0x90] sm:$0xf]  ;;  %v3617_v39 = vor.u32 %v4824_v31, %v3614_v32  ;;  %v4845_v57 = vld [vmem:[#allocation2 + $0x374] sm:$0xf0]  ;;  %v3493_v63 = vor.u32 %v4797_v53, %v3492_v52 }
  0x64   : > { %v3649_v27 = vor.u32 %v4832_v19, %v3646_v20  ;;  %v3325_v33 = vor.u32 %v4756_v26, %v3324_v25  ;;  %v3358_v36 = vld [vmem:[#allocation2 + $0xf0] sm:$0xf0]  ;;  %v3292_v37 = vld [vmem:[#allocation2 + $0x50] sm:$0xf]  ;;  %v3652_v6 = vld [vmem:[#allocation2 + $0x318] sm:$0xf] }
  0x65   : > { %1018 = vmatpush.bf16.msrb.mxu0 %v3353_v30  ;;  %1033 = vmatpush.bf16.msrb.mxu2 %v3545_v35  ;;  %v3548_v30 = vld [vmem:[#allocation2 + $0x250] sm:$0xf]  ;;  %v4760_v35 = vld [vmem:[#allocation2 + $0xd4] sm:$0xf]  ;;  %v4837_v7 = vld [vmem:[#allocation2 + $0x334] sm:$0xf0] }
  0x66   : > { %3692 = vmatmul.msk.bf16.vlgmr.msrb.gmra.mxu3 %vm932_vm0, %v5436_v41  ;;  %v4748_v38 = vld [vmem:[#allocation2 + $0x6c] sm:$0xf0]  ;;  %v3361_v42 = vor.u32 %v4760_v35, %v3358_v36  ;;  %v4816_v45 = vld [vmem:[#allocation2 + $0x294] sm:$0xf]  ;;  %v3428_v14 = vld [vmem:[#allocation2 + $0x158] sm:$0xf] }
  0x67   : > { %1040 = vmatpush.bf16.msra.mxu3 %v3485_v29  ;;  %994 = vmatpush.bf16.msrb.mxu1 %v3285_v34  ;;  %v3393_v29 = vor.u32 %v4768_v23, %v3390_v24  ;;  %v4812_v34 = vld [vmem:[#allocation2 + $0x26c] sm:$0xf0]  ;;  %v3582_v46 = vld [vmem:[#allocation2 + $0x2b0] sm:$0xf0]  ;;  %v4781_v18 = vld [vmem:[#allocation2 + $0x174] sm:$0xf0] }
  0x68   : > { %v3549_v40 = vor.u32 %v4812_v34, %v3548_v30  ;;  %v3516_v44 = vld [vmem:[#allocation2 + $0x210] sm:$0xf]  ;;  %v4752_v49 = vld [vmem:[#allocation2 + $0x94] sm:$0xf]  ;;  %v4841_v19 = vld [vmem:[#allocation2 + $0x35c] sm:$0xf]  ;;  %v3429_v26 = vor.u32 %v4781_v18, %v3428_v14 }
  0x69   : > { %1019 = vmatpush.bf16.msrb.mxu0 %v3321_v47  ;;  %1034 = vmatpush.bf16.msrb.mxu2 %v3513_v51  ;;  %v3293_v47 = vor.u32 %v4748_v38, %v3292_v37  ;;  %v4804_v48 = vld [vmem:[#allocation2 + $0x22c] sm:$0xf0]  ;;  %v4808_v60 = vld [vmem:[#allocation2 + $0x254] sm:$0xf]  ;;  %v3686_v20 = vld [vmem:[#allocation2 + $0x378] sm:$0xf0] }
  0x6a   : > { %v4740_v51 = vld [vmem:[#allocation2 + $0x2c] sm:$0xf0]  ;;  %v3550_v61 = vld [vmem:[#allocation2 + $0x270] sm:$0xf0]  ;;  %v3620_v22 = vld [vmem:[#allocation2 + $0x2d8] sm:$0xf] }
  0x6b   : > { %1041 = vmatpush.bf16.msra.mxu3 %v3453_v43  ;;  %995 = vmatpush.bf16.msrb.mxu1 %v3253_v50  ;;  %v3260_v43 = vld [vmem:[#allocation2 + $0x10] sm:$0xf]  ;;  %v3326_v50 = vld [vmem:[#allocation2 + $0xb0] sm:$0xf0]  ;;  %v3553_v5 = vor.u32 %v4808_v60, %v3550_v61  ;;  %v4829_v23 = vld [vmem:[#allocation2 + $0x2f4] sm:$0xf0] }
  0x6c   : > { %3693 = vmatmul.msk.bf16.vlgmr.msrb.gmra.mxu2 %vm932_vm0, %v5436_v41  ;;  %v3329_v59 = vor.u32 %v4752_v49, %v3326_v50  ;;  %v4744_v0 = vld [vmem:[#allocation2 + $0x54] sm:$0xf]  ;;  %v3462_v30 = vld [vmem:[#allocation2 + $0x1b8] sm:$0xf0]  ;;  %v3621_v31 = vor.u32 %v4829_v23, %v3620_v22  ;;  %v4773_v32 = vld [vmem:[#allocation2 + $0x134] sm:$0xf0] }
  0x6d   : > { %1066 = vmatpush.bf16.msra.mxu2 %v3489_v55  ;;  %1020 = vmatpush.bf16.msrb.mxu0 %v3289_v62  ;;  %v3684_v55 = vld [vmem:[#allocation2 + $0x358] sm:$0xf]  ;;  %v3261_v62 = vor.u32 %v4740_v51, %v3260_v43  ;;  %v3294_v1 = vld [vmem:[#allocation2 + $0x70] sm:$0xf0]  ;;  %v3654_v34 = vld [vmem:[#allocation2 + $0x338] sm:$0xf0] }
  0x6e   : > { %996 = vmatmul.bf16.vlgmr.msrb.gmra.mxu1 %v5442_v56  ;;  %v3685_v2 = vor.u32 %v4845_v57, %v3684_v55  ;;  %v3297_v9 = vor.u32 %v4744_v0, %v3294_v1  ;;  %v3262_v10 = vld [vmem:[#allocation2 + $0x30] sm:$0xf0]  ;;  %v3588_v35 = vld [vmem:[#allocation2 + $0x298] sm:$0xf]  ;;  %v3430_v43 = vld [vmem:[#allocation2 + $0x178] sm:$0xf0] }
  0x6f   : > { %1055 = vmatpush.bf16.msra.mxu1 %v3677_v54  ;;  %1042 = vmatpush.bf16.msra.mxu3 %v3421_v58  ;;  %v3585_v54 = vor.u32 %v4816_v45, %v3582_v46  ;;  %v3517_v58 = vor.u32 %v4804_v48, %v3516_v44  ;;  %v4800_v11 = vld [vmem:[#allocation2 + $0x214] sm:$0xf]  ;;  %v4821_v36 = vld [vmem:[#allocation2 + $0x2b4] sm:$0xf0]  ;;  %v4825_v46 = vld [vmem:[#allocation2 + $0x2dc] sm:$0xf] }
  0x70   : > { %v3589_v44 = vor.u32 %v4821_v36, %v3588_v35  ;;  %v4765_v45 = vld [vmem:[#allocation2 + $0xf4] sm:$0xf0]  ;;  %v3398_v55 = vld [vmem:[#allocation2 + $0x138] sm:$0xf0]  ;;  %v3821_v0 = vld [vmem:[%s5423_s24 + $0xe0] sm:$0xf] }
  0x71   : > { %1067 = vmatpush.bf16.msra.mxu2 %v3457_v4  ;;  %1021 = vmatpush.bf16.msrb.mxu0 %v3257_v12  ;;  %v4789_v4 = vld [vmem:[#allocation2 + $0x1b4] sm:$0xf0]  ;;  %v3518_v12 = vld [vmem:[#allocation2 + $0x230] sm:$0xf0]  ;;  %v3590_v60 = vld [vmem:[#allocation2 + $0x2b8] sm:$0xf0] }
  0x72   : > { %v3556_v48 = vld [vmem:[#allocation2 + $0x258] sm:$0xf]  ;;  %v4876_v1 = vld [vmem:[%s5423_s24 + $0xec] sm:$0xf0]  ;;  %v3334_v18 = vld [vmem:[#allocation2 + $0xb8] sm:$0xf0] }
  0x73   : > { %1056 = vmatpush.bf16.msra.mxu1 %v3645_v3  ;;  %1043 = vmatpush.bf16.msra.mxu3 %v3389_v8  ;;  %v3460_v3 = vld [vmem:[#allocation2 + $0x198] sm:$0xf]  ;;  %v4736_v8 = vld [vmem:[#allocation2 + $0x14] sm:$0xf]  ;;  %v4872_v14 = vld [vmem:[%s5423_s24 + $0xcc] sm:$0xf0] }
  0x74   : > { %1022 = vmatmul.bf16.vlgmr.msrb.gmra.mxu0 %v5442_v56  ;;  %v3461_v13 = vor.u32 %v4789_v4, %v3460_v3  ;;  %v3265_v24 = vor.u32 %v4736_v8, %v3262_v10  ;;  %v4813_v49 = vld [vmem:[#allocation2 + $0x274] sm:$0xf0]  ;;  %v4761_v4 = vld [vmem:[#allocation2 + $0xdc] sm:$0xf]  ;;  %p6020_p5 = scmp.lt.s32.totalorder %s3240_s7, 7 }
  0x75   : > { %1081 = vmatpush.bf16.msra.mxu0 %v3681_v15  ;;  %1068 = vmatpush.bf16.msra.mxu2 %v3425_v17  ;;  %v4793_v15 = vld [vmem:[#allocation2 + $0x1dc] sm:$0xf]  ;;  %v3653_v17 = vor.u32 %v4837_v7, %v3652_v6  ;;  %v3332_v53 = vld [vmem:[#allocation2 + $0x98] sm:$0xf]  ;;  %v3557_v57 = vor.u32 %v4813_v49, %v3556_v48  ;;  %v4205_v49 = vld [vmem:[%s5423_s24 + $0x3e0] sm:$0xf] }
  0x76   : > { %v3524_v61 = vld [vmem:[#allocation2 + $0x218] sm:$0xf]  ;;  %v3558_v10 = vld [vmem:[#allocation2 + $0x278] sm:$0xf0]  ;;  %s6106_s7 = smov (!%p6020_p5, %s3240_s7), 7 }
  0x77   : > { %1057 = vmatpush.bf16.msra.mxu1 %v3613_v16  ;;  %1044 = vmatpush.bf16.msra.mxu3 %v3357_v21  ;;  %v3494_v16 = vld [vmem:[#allocation2 + $0x1f8] sm:$0xf0]  ;;  %v3521_v21 = vor.u32 %v4800_v11, %v3518_v12  ;;  %v3300_v7 = vld [vmem:[#allocation2 + $0x58] sm:$0xf]  ;;  %v3822_v11 = vor.u32 %v4876_v1, %v3821_v0  ;;  %v3901_v0 = vld [vmem:[%s5423_s24 + $0x180] sm:$0xf] }
  0x78   : > { %v3497_v25 = vor.u32 %v4793_v15, %v3494_v16  ;;  %v4749_v8 = vld [vmem:[#allocation2 + $0x74] sm:$0xf0]  ;;  %v3526_v22 = vld [vmem:[#allocation2 + $0x238] sm:$0xf0]  ;;  %v4896_v1 = vld [vmem:[%s5423_s24 + $0x18c] sm:$0xf0] }
  0x79   : > { %1082 = vmatpush.bf16.msra.mxu0 %v3649_v27  ;;  %1069 = vmatpush.bf16.msra.mxu2 %v3393_v29  ;;  %v3689_v27 = vor.u32 %v4841_v19, %v3686_v20  ;;  %v4785_v29 = vld [vmem:[#allocation2 + $0x19c] sm:$0xf]  ;;  %v3301_v15 = vor.u32 %v4749_v8, %v3300_v7  ;;  %v3268_v16 = vld [vmem:[#allocation2 + $0x18] sm:$0xf]  ;;  %v4892_v7 = vld [vmem:[%s5423_s24 + $0x16c] sm:$0xf0] }
  0x7a   : > { %v3465_v37 = vor.u32 %v4785_v29, %v3462_v30  ;;  %v4741_v20 = vld [vmem:[#allocation2 + $0x34] sm:$0xf0]  ;;  %v4077_v29 = vld [vmem:[%s5423_s24 + $0x2e0] sm:$0xf]  ;;  %v4940_v30 = vld [vmem:[%s5423_s24 + $0x2ec] sm:$0xf0] }
  0x7b   : > { %1058 = vmatpush.bf16.msra.mxu1 %v3581_v28  ;;  %1045 = vmatpush.bf16.msra.mxu3 %v3325_v33  ;;  %v3396_v28 = vld [vmem:[#allocation2 + $0x118] sm:$0xf]  ;;  %v4833_v33 = vld [vmem:[#allocation2 + $0x31c] sm:$0xf]  ;;  %v3725_v8 = vld [vmem:[%s5423_s24 + $0x20] sm:$0xf] }
  0x7c   : > { %v3397_v38 = vor.u32 %v4773_v32, %v3396_v28  ;;  %v4868_v28 = vld [vmem:[%s5423_s24 + $0xac] sm:$0xf0]  ;;  %v4745_v32 = vld [vmem:[#allocation2 + $0x5c] sm:$0xf]  ;;  %s3241_s5 = sshll.u32 %s6106_s7, 3 }
  0x7d   : > { %1083 = vmatpush.bf16.msra.mxu0 %v3617_v39  ;;  %1070 = vmatpush.bf16.msra.mxu2 %v3361_v42  ;;  %v3657_v39 = vor.u32 %v4833_v33, %v3654_v34  ;;  %v4777_v42 = vld [vmem:[#allocation2 + $0x15c] sm:$0xf]  ;;  %s6052_s8 = scalar_lea.vmem %s6095_s4, %s3241_s5 }
  0x7e   : > { %v3433_v50 = vor.u32 %v4777_v42, %v3430_v43  ;;  %v3302_v33 = vld [vmem:[#allocation2 + $0x78] sm:$0xf0]  ;;  %v4864_v43 = vld [vmem:[%s5423_s24 + $0x8c] sm:$0xf0] }
  0x7f   : > { %1059 = vmatpush.bf16.msra.mxu1 %v3549_v40  ;;  %1046 = vmatpush.bf16.msra.mxu3 %v3293_v47  ;;  %v3364_v40 = vld [vmem:[#allocation2 + $0xd8] sm:$0xf]  ;;  %v3622_v47 = vld [vmem:[#allocation2 + $0x2f8] sm:$0xf0]  ;;  %v3305_v42 = vor.u32 %v4745_v32, %v3302_v33  ;;  %v4880_v32 = vld [vmem:[%s5423_s24 + $0x10c] sm:$0xf0] }
  0x80   : > { %v3365_v51 = vor.u32 %v4765_v45, %v3364_v40  ;;  %v3625_v52 = vor.u32 %v4825_v46, %v3622_v47  ;;  %v4078_v40 = vor.u32 %v4940_v30, %v4077_v29  ;;  %v4936_v45 = vld [vmem:[%s5423_s24 + $0x2cc] sm:$0xf0]  ;;  %v4737_v46 = vld [vmem:[#allocation2 + $0x1c] sm:$0xf] }
  0x81   : > { %1084 = vmatpush.bf16.msra.mxu0 %v3585_v54  ;;  %1071 = vmatpush.bf16.msra.mxu2 %v3329_v59  ;;  %v4769_v54 = vld [vmem:[#allocation2 + $0x11c] sm:$0xf]  ;;  %v4968_v30 = vld [vmem:[%s5423_s24 + $0x3cc] sm:$0xf0] }
  0x82   : > { %v4817_v59 = vld [vmem:[#allocation2 + $0x29c] sm:$0xf] }
  0x83   : > { %1060 = vmatpush.bf16.msra.mxu1 %v3517_v58  ;;  %1047 = vmatpush.bf16.msra.mxu3 %v3261_v62  ;;  %v4757_v58 = vld [vmem:[#allocation2 + $0xb4] sm:$0xf0]  ;;  %v3593_v3 = vor.u32 %v4817_v59, %v3590_v60  ;;  %v3270_v47 = vld [vmem:[#allocation2 + $0x38] sm:$0xf0]  ;;  %v4045_v59 = vld [vmem:[%s5423_s24 + $0x2a0] sm:$0xf] }
  0x84   : > { %v4805_v62 = vld [vmem:[#allocation2 + $0x234] sm:$0xf0]  ;;  %v4932_v60 = vld [vmem:[%s5423_s24 + $0x2ac] sm:$0xf0] }
  0x85   : > { %1085 = vmatpush.bf16.msra.mxu0 %v3553_v5  ;;  %1072 = vmatpush.bf16.msra.mxu2 %v3297_v9  ;;  %v3366_v5 = vld [vmem:[#allocation2 + $0xf8] sm:$0xf0]  ;;  %v3525_v6 = vor.u32 %v4805_v62, %v3524_v61 }
  0x86   : > { %3694 = vmatmul.msk.bf16.vlgmr.msra.gmra.mxu1 %vm932_vm0, %v5436_v41  ;;  %1048 = vmatmul.bf16.vlgmr.msra.gmra.mxu3 %v5442_v56  ;;  %v4809_v9 = vld [vmem:[#allocation2 + $0x25c] sm:$0xf]  ;;  %v3369_v12 = vor.u32 %v4761_v4, %v3366_v5  ;;  %v4046_v4 = vor.u32 %v4932_v60, %v4045_v59  ;;  %v4960_v59 = vld [vmem:[%s5423_s24 + $0x38c] sm:$0xf0] }
  0x87   : > { %1092 = vmatpush.bf16.msrb.mxu1 %v3493_v63  ;;  %1107 = vmatpush.bf16.msrb.mxu3 %v3685_v2  ;;  %v3401_v63 = vor.u32 %v4769_v54, %v3398_v55  ;;  %v3333_v2 = vor.u32 %v4757_v58, %v3332_v53  ;;  %v3561_v19 = vor.u32 %v4809_v9, %v3558_v10  ;;  %v4900_v53 = vld [vmem:[%s5423_s24 + $0x1ac] sm:$0xf0] }
  0x88   : > { %v3273_v55 = vor.u32 %v4737_v46, %v3270_v47  ;;  %v4860_v58 = vld [vmem:[%s5423_s24 + $0x6c] sm:$0xf0]  ;;  %v4285_v47 = vld [vmem:[%s5423_s24 + $0x480] sm:$0xf] }
  0x89   : > { %1086 = vmatpush.bf16.msra.mxu0 %v3521_v21  ;;  %1073 = vmatpush.bf16.msra.mxu2 %v3265_v24  ;;  %v4801_v21 = vld [vmem:[#allocation2 + $0x21c] sm:$0xf]  ;;  %v3789_v24 = vld [vmem:[%s5423_s24 + $0xa0] sm:$0xf]  ;;  %v4852_v9 = vld [vmem:[%s5423_s24 + $0x2c] sm:$0xf0] }
  0x8a   : > { %v3529_v34 = vor.u32 %v4801_v21, %v3526_v22  ;;  %v3790_v36 = vor.u32 %v4868_v28, %v3789_v24  ;;  %v4317_v22 = vld [vmem:[%s5423_s24 + $0x4c0] sm:$0xf]  ;;  %v4964_v46 = vld [vmem:[%s5423_s24 + $0x3ac] sm:$0xf0] }
  0x8b   : > { %1093 = vmatpush.bf16.msrb.mxu1 %v3461_v13  ;;  %1108 = vmatpush.bf16.msrb.mxu3 %v3653_v17  ;;  %v3805_v13 = vld [vmem:[%s5423_s24 + $0xc0] sm:$0xf]  ;;  %v4753_v17 = vld [vmem:[#allocation2 + $0x9c] sm:$0xf] }
  0x8c   : > { %3695 = vmatmul.msk.bf16.vlgmr.msra.gmra.mxu0 %vm932_vm0, %v5436_v41  ;;  %1074 = vmatmul.bf16.vlgmr.msra.gmra.mxu2 %v5442_v56  ;;  %v3806_v23 = vor.u32 %v4872_v14, %v3805_v13  ;;  %v4888_v13 = vld [vmem:[%s5423_s24 + $0x14c] sm:$0xf0]  ;;  %v4189_v28 = vld [vmem:[%s5423_s24 + $0x3c0] sm:$0xf] }
  0x8d   : > { %1118 = vmatpush.bf16.msrb.mxu0 %v3497_v25  ;;  %1133 = vmatpush.bf16.msrb.mxu2 %v3689_v27  ;;  %v3949_v25 = vld [vmem:[%s5423_s24 + $0x1e0] sm:$0xf]  ;;  %v3337_v27 = vor.u32 %v4753_v17, %v3334_v18  ;;  %v4848_v14 = vld [vmem:[%s5423_s24 + $0xc] sm:$0xf0]  ;;  %v4190_v33 = vor.u32 %v4968_v30, %v4189_v28 }
  0x8e   : > { %v4109_v28 = vld [vmem:[%s5423_s24 + $0x320] sm:$0xf] }
  0x8f   : > { %1094 = vmatpush.bf16.msrb.mxu1 %v3429_v26  ;;  %1109 = vmatpush.bf16.msrb.mxu3 %v3621_v31  ;;  %v4908_v26 = vld [vmem:[%s5423_s24 + $0x1ec] sm:$0xf0]  ;;  %v3269_v31 = vor.u32 %v4741_v20, %v3268_v16 }
  0x90   : > { %v3950_v35 = vor.u32 %v4908_v26, %v3949_v25  ;;  %v5004_v16 = vld [vmem:[%s5423_s24 + $0x4ec] sm:$0xf0]  ;;  %v4029_v26 = vld [vmem:[%s5423_s24 + $0x280] sm:$0xf] }
  0x91   : > { %1119 = vmatpush.bf16.msrb.mxu0 %v3465_v37  ;;  %1134 = vmatpush.bf16.msrb.mxu2 %v3657_v39  ;;  %v3773_v37 = vld [vmem:[%s5423_s24 + $0x80] sm:$0xf]  ;;  %v4904_v39 = vld [vmem:[%s5423_s24 + $0x1cc] sm:$0xf0] }
  0x92   : > { %v4884_v20 = vld [vmem:[%s5423_s24 + $0x12c] sm:$0xf0] }
  0x93   : > { %1095 = vmatpush.bf16.msrb.mxu1 %v3397_v38  ;;  %1110 = vmatpush.bf16.msrb.mxu3 %v3589_v44  ;;  %v3933_v38 = vld [vmem:[%s5423_s24 + $0x1c0] sm:$0xf] }
  0x94   : > { %v4061_v44 = vld [vmem:[%s5423_s24 + $0x2c0] sm:$0xf]  ;;  %v3934_v48 = vor.u32 %v4904_v39, %v3933_v38  ;;  %v5036_v39 = vld [vmem:[%s5423_s24 + $0x5ec] sm:$0xf0] }
  0x95   : > { %1120 = vmatpush.bf16.msrb.mxu0 %v3433_v50  ;;  %1135 = vmatpush.bf16.msrb.mxu2 %v3625_v52  ;;  %v4972_v50 = vld [vmem:[%s5423_s24 + $0x3ec] sm:$0xf0]  ;;  %v3917_v52 = vld [vmem:[%s5423_s24 + $0x1a0] sm:$0xf]  ;;  %v4062_v54 = vor.u32 %v4936_v45, %v4061_v44 }
  0x96   : > { %v4206_v61 = vor.u32 %v4972_v50, %v4205_v49  ;;  %v3918_v62 = vor.u32 %v4900_v53, %v3917_v52  ;;  %v4173_v45 = vld [vmem:[%s5423_s24 + $0x3a0] sm:$0xf]  ;;  %v4992_v49 = vld [vmem:[%s5423_s24 + $0x48c] sm:$0xf0] }
  0x97   : > { %1096 = vmatpush.bf16.msrb.mxu1 %v3365_v51  ;;  %1111 = vmatpush.bf16.msrb.mxu3 %v3557_v57  ;;  %v3774_v51 = vor.u32 %v4864_v43, %v3773_v37  ;;  %v3757_v57 = vld [vmem:[%s5423_s24 + $0x60] sm:$0xf]  ;;  %v4286_v52 = vor.u32 %v4992_v49, %v4285_v47  ;;  %v5100_v49 = vld [vmem:[%s5423_s24 + $0x7ec] sm:$0xf0] }
  0x98   : > { %v4461_v37 = vld [vmem:[%s5423_s24 + $0x5e0] sm:$0xf] }
  0x99   : > { %1121 = vmatpush.bf16.msrb.mxu0 %v3401_v63  ;;  %1136 = vmatpush.bf16.msrb.mxu2 %v3593_v3  ;;  %v3758_v63 = vor.u32 %v4860_v58, %v3757_v57  ;;  %v4856_v3 = vld [vmem:[%s5423_s24 + $0x4c] sm:$0xf0]  ;;  %v4462_v43 = vor.u32 %v5036_v39, %v4461_v37  ;;  %v4445_v50 = vld [vmem:[%s5423_s24 + $0x5c0] sm:$0xf] }
  0x9a   : > { %v4157_v57 = vld [vmem:[%s5423_s24 + $0x380] sm:$0xf] }
  0x9b   : > { %1097 = vmatpush.bf16.msrb.mxu1 %v3333_v2  ;;  %1112 = vmatpush.bf16.msrb.mxu3 %v3525_v6  ;;  %v3741_v2 = vld [vmem:[%s5423_s24 + $0x40] sm:$0xf]  ;;  %v4158_v60 = vor.u32 %v4960_v59, %v4157_v57  ;;  %v5056_v59 = vld [vmem:[%s5423_s24 + $0x68c] sm:$0xf0] }
  0x9c   : > { %v3742_v5 = vor.u32 %v4856_v3, %v3741_v2  ;;  %v3885_v6 = vld [vmem:[%s5423_s24 + $0x160] sm:$0xf]  ;;  %v4916_v3 = vld [vmem:[%s5423_s24 + $0x22c] sm:$0xf0] }
  0x9d   : > { %1122 = vmatpush.bf16.msrb.mxu0 %v3369_v12  ;;  %1137 = vmatpush.bf16.msrb.mxu2 %v3561_v19  ;;  %v3886_v10 = vor.u32 %v4892_v7, %v3885_v6  ;;  %v3869_v12 = vld [vmem:[%s5423_s24 + $0x140] sm:$0xf]  ;;  %v4956_v6 = vld [vmem:[%s5423_s24 + $0x36c] sm:$0xf0] }
  0x9e   : > { %3696 = vmatmul.msk.bf16.vlgmr.msrb.gmra.mxu3 %vm932_vm0, %v5436_v41  ;;  %v3870_v17 = vor.u32 %v4888_v13, %v3869_v12  ;;  %v3853_v19 = vld [vmem:[%s5423_s24 + $0x120] sm:$0xf] }
  0x9f   : > { %2718 = vmatpush.bf16.msra.mxu3 %v3822_v11  ;;  %1098 = vmatpush.bf16.msrb.mxu1 %v3301_v15  ;;  %v3726_v11 = vor.u32 %v4852_v9, %v3725_v8  ;;  %v4333_v15 = vld [vmem:[%s5423_s24 + $0x4e0] sm:$0xf]  ;;  %v3854_v24 = vor.u32 %v4884_v20, %v3853_v19  ;;  %v4984_v9 = vld [vmem:[%s5423_s24 + $0x44c] sm:$0xf0] }
  0xa0   : > { %v4334_v21 = vor.u32 %v5004_v16, %v4333_v15  ;;  %v3981_v2 = vld [vmem:[%s5423_s24 + $0x220] sm:$0xf]  ;;  %v5068_v19 = vld [vmem:[%s5423_s24 + $0x6ec] sm:$0xf0] }
  0xa1   : > { %1123 = vmatpush.bf16.msrb.mxu0 %v3337_v27  ;;  %1138 = vmatpush.bf16.msrb.mxu2 %v3529_v34  ;;  %v4928_v27 = vld [vmem:[%s5423_s24 + $0x28c] sm:$0xf0]  ;;  %v4253_v7 = vld [vmem:[%s5423_s24 + $0x440] sm:$0xf] }
  0xa2   : > { %v4030_v29 = vor.u32 %v4928_v27, %v4029_v26  ;;  %v4254_v12 = vor.u32 %v4984_v9, %v4253_v7  ;;  %v4125_v15 = vld [vmem:[%s5423_s24 + $0x340] sm:$0xf]  ;;  %v5020_v26 = vld [vmem:[%s5423_s24 + $0x56c] sm:$0xf0] }
  0xa3   : > { %2719 = vmatpush.bf16.msra.mxu3 %v3806_v23  ;;  %1099 = vmatpush.bf16.msrb.mxu1 %v3269_v31  ;;  %v5000_v23 = vld [vmem:[%s5423_s24 + $0x4cc] sm:$0xf0]  ;;  %v3837_v31 = vld [vmem:[%s5423_s24 + $0x100] sm:$0xf] }
  0xa4   : > { %3697 = vmatmul.msk.bf16.vlgmr.msrb.gmra.mxu2 %vm932_vm0, %v5436_v41  ;;  %v3902_v41 = vor.u32 %v4896_v1, %v3901_v0  ;;  %v4318_v25 = vor.u32 %v5000_v23, %v4317_v22  ;;  %v3838_v34 = vor.u32 %v4880_v32, %v3837_v31  ;;  %v5028_v1 = vld [vmem:[%s5423_s24 + $0x5ac] sm:$0xf0]  ;;  %v4237_v22 = vld [vmem:[%s5423_s24 + $0x420] sm:$0xf] }
  0xa5   : > { %2744 = vmatpush.bf16.msra.mxu2 %v4078_v40  ;;  %1124 = vmatpush.bf16.msrb.mxu0 %v3305_v42  ;;  %v4013_v40 = vld [vmem:[%s5423_s24 + $0x260] sm:$0xf]  ;;  %v4924_v42 = vld [vmem:[%s5423_s24 + $0x26c] sm:$0xf0] }
  0xa6   : > { %1100 = vmatmul.bf16.vlgmr.msrb.gmra.mxu1 %v5442_v56  ;;  %v4014_v44 = vor.u32 %v4924_v42, %v4013_v40  ;;  %v4980_v23 = vld [vmem:[%s5423_s24 + $0x42c] sm:$0xf0]  ;;  %v4573_v31 = vld [vmem:[%s5423_s24 + $0x6c0] sm:$0xf] }
  0xa7   : > { %2731 = vmatpush.bf16.msra.mxu1 %v3950_v35  ;;  %2720 = vmatpush.bf16.msra.mxu3 %v3790_v36  ;;  %v4301_v35 = vld [vmem:[%s5423_s24 + $0x4a0] sm:$0xf]  ;;  %v4996_v36 = vld [vmem:[%s5423_s24 + $0x4ac] sm:$0xf0] }
  0xa8   : > { %v4302_v38 = vor.u32 %v4996_v36, %v4301_v35  ;;  %v5064_v32 = vld [vmem:[%s5423_s24 + $0x6cc] sm:$0xf0]  ;;  %v4381_v36 = vld [vmem:[%s5423_s24 + $0x540] sm:$0xf] }
  0xa9   : > { %2745 = vmatpush.bf16.msra.mxu2 %v4062_v54  ;;  %1125 = vmatpush.bf16.msrb.mxu0 %v3273_v55  ;;  %v3997_v54 = vld [vmem:[%s5423_s24 + $0x240] sm:$0xf]  ;;  %v4920_v55 = vld [vmem:[%s5423_s24 + $0x24c] sm:$0xf0] }
  0xaa   : > { %v3998_v58 = vor.u32 %v4920_v55, %v3997_v54  ;;  %v4976_v35 = vld [vmem:[%s5423_s24 + $0x40c] sm:$0xf0]  ;;  %v4093_v42 = vld [vmem:[%s5423_s24 + $0x300] sm:$0xf] }
  0xab   : > { %2732 = vmatpush.bf16.msra.mxu1 %v3934_v48  ;;  %2721 = vmatpush.bf16.msra.mxu3 %v3774_v51  ;;  %v4174_v48 = vor.u32 %v4964_v46, %v4173_v45  ;;  %v5032_v51 = vld [vmem:[%s5423_s24 + $0x5cc] sm:$0xf0]  ;;  %v4557_v45 = vld [vmem:[%s5423_s24 + $0x6a0] sm:$0xf] }
  0xac   : > { %1126 = vmatmul.bf16.vlgmr.msrb.gmra.mxu0 %v5442_v56  ;;  %v3709_v56 = vld [vmem:[%s5423_s24] sm:$0xf]  ;;  %v4446_v53 = vor.u32 %v5032_v51, %v4445_v50  ;;  %v5060_v46 = vld [vmem:[%s5423_s24 + $0x6ac] sm:$0xf0] }
  0xad   : > { %2757 = vmatpush.bf16.msra.mxu0 %v4206_v61  ;;  %2746 = vmatpush.bf16.msra.mxu2 %v4046_v4  ;;  %v3710_v18 = vor.u32 %v4848_v14, %v3709_v56  ;;  %v4269_v61 = vld [vmem:[%s5423_s24 + $0x460] sm:$0xf]  ;;  %v4912_v14 = vld [vmem:[%s5423_s24 + $0x20c] sm:$0xf0] }
  0xae   : > { %v3965_v56 = vld [vmem:[%s5423_s24 + $0x200] sm:$0xf]  ;;  %v5012_v51 = vld [vmem:[%s5423_s24 + $0x52c] sm:$0xf0] }
  0xaf   : > { %2733 = vmatpush.bf16.msra.mxu1 %v3918_v62  ;;  %2722 = vmatpush.bf16.msra.mxu3 %v3758_v63  ;;  %v4988_v62 = vld [vmem:[%s5423_s24 + $0x46c] sm:$0xf0]  ;;  %v4429_v63 = vld [vmem:[%s5423_s24 + $0x5a0] sm:$0xf]  ;;  %v3966_v16 = vor.u32 %v4912_v14, %v3965_v56  ;;  %v4870_v14 = vld [vmem:[%s5423_s24 + $0xc4] sm:$0xf] }
  0xb0   : > { %v4270_v0 = vor.u32 %v4988_v62, %v4269_v61  ;;  %v4430_v4 = vor.u32 %v5028_v1, %v4429_v63  ;;  %v4717_v47 = vld [vmem:[%s5423_s24 + $0x7e0] sm:$0xf]  ;;  %v5096_v62 = vld [vmem:[%s5423_s24 + $0x7cc] sm:$0xf0] }
  0xb1   : > { %2747 = vmatpush.bf16.msra.mxu2 %v4030_v29  ;;  %2758 = vmatpush.bf16.msra.mxu0 %v4190_v33  ;;  %v4948_v29 = vld [vmem:[%s5423_s24 + $0x32c] sm:$0xf0]  ;;  %v4574_v33 = vor.u32 %v5064_v32, %v4573_v31  ;;  %v4365_v50 = vld [vmem:[%s5423_s24 + $0x520] sm:$0xf] }
  0xb2   : > { %v4110_v30 = vor.u32 %v4948_v29, %v4109_v28  ;;  %v4349_v63 = vld [vmem:[%s5423_s24 + $0x500] sm:$0xf]  ;;  %v4906_v29 = vld [vmem:[%s5423_s24 + $0x1e4] sm:$0xf] }
  0xb3   : > { %2734 = vmatpush.bf16.msra.mxu1 %v3902_v41  ;;  %2723 = vmatpush.bf16.msra.mxu3 %v3742_v5  ;;  %v3982_v41 = vor.u32 %v4916_v3, %v3981_v2  ;;  %v4141_v5 = vld [vmem:[%s5423_s24 + $0x360] sm:$0xf]  ;;  %v4874_v2 = vld [vmem:[%s5423_s24 + $0xe4] sm:$0xf]  ;;  %v3823_v3 = vld [vmem:[%s5423_s24 + $0xf0] sm:$0xf0] }
  0xb4   : > { %v4142_v8 = vor.u32 %v4956_v6, %v4141_v5  ;;  %v4525_v7 = vld [vmem:[%s5423_s24 + $0x660] sm:$0xf]  ;;  %v3826_v9 = vor.u32 %v4874_v2, %v3823_v3  ;;  %v4894_v3 = vld [vmem:[%s5423_s24 + $0x184] sm:$0xf] }
  0xb5   : > { %2748 = vmatpush.bf16.msra.mxu2 %v4014_v44  ;;  %2759 = vmatpush.bf16.msra.mxu0 %v4174_v48  ;;  %v4558_v48 = vor.u32 %v5060_v46, %v4557_v45  ;;  %v4493_v32 = vld [vmem:[%s5423_s24 + $0x620] sm:$0xf]  ;;  %v4862_v46 = vld [vmem:[%s5423_s24 + $0x84] sm:$0xf] }
  0xb7   : > { %2735 = vmatpush.bf16.msra.mxu1 %v3886_v10  ;;  %2724 = vmatpush.bf16.msra.mxu3 %v3726_v11  ;;  %v4413_v10 = vld [vmem:[%s5423_s24 + $0x580] sm:$0xf]  ;;  %v5024_v11 = vld [vmem:[%s5423_s24 + $0x58c] sm:$0xf0] }
  0xb8   : > { %v4414_v13 = vor.u32 %v5024_v11, %v4413_v10  ;;  %v4685_v11 = vld [vmem:[%s5423_s24 + $0x7a0] sm:$0xf] }
  0xb9   : > { %2749 = vmatpush.bf16.msra.mxu2 %v3998_v58  ;;  %2760 = vmatpush.bf16.msra.mxu0 %v4158_v60  ;;  %v4541_v58 = vld [vmem:[%s5423_s24 + $0x680] sm:$0xf] }
  0xba   : > { %v4701_v60 = vld [vmem:[%s5423_s24 + $0x7c0] sm:$0xf]  ;;  %v4542_v61 = vor.u32 %v5056_v59, %v4541_v58  ;;  %v4858_v58 = vld [vmem:[%s5423_s24 + $0x64] sm:$0xf]  ;;  %v3759_v59 = vld [vmem:[%s5423_s24 + $0x70] sm:$0xf0] }
  0xbb   : > { %2736 = vmatpush.bf16.msra.mxu1 %v3870_v17  ;;  %2725 = vmatpush.bf16.msra.mxu3 %v3710_v18  ;;  %v4952_v17 = vld [vmem:[%s5423_s24 + $0x34c] sm:$0xf0]  ;;  %v4589_v18 = vld [vmem:[%s5423_s24 + $0x6e0] sm:$0xf]  ;;  %v3762_v2 = vor.u32 %v4858_v58, %v3759_v59  ;;  %v4926_v58 = vld [vmem:[%s5423_s24 + $0x284] sm:$0xf] }
  0xbc   : > { %v4126_v20 = vor.u32 %v4952_v17, %v4125_v15  ;;  %v3807_v15 = vld [vmem:[%s5423_s24 + $0xd0] sm:$0xf0] }
  0xbd   : > { %2750 = vmatpush.bf16.msra.mxu2 %v3982_v41  ;;  %2761 = vmatpush.bf16.msra.mxu0 %v4142_v8  ;;  %v5052_v8 = vld [vmem:[%s5423_s24 + $0x66c] sm:$0xf0]  ;;  %v3810_v28 = vor.u32 %v4870_v14, %v3807_v15  ;;  %v3887_v14 = vld [vmem:[%s5423_s24 + $0x170] sm:$0xf0]  ;;  %v4605_v15 = vld [vmem:[%s5423_s24 + $0x700] sm:$0xf] }
  0xbe   : > { %v4526_v10 = vor.u32 %v5052_v8, %v4525_v7  ;;  %v3743_v7 = vld [vmem:[%s5423_s24 + $0x50] sm:$0xf0]  ;;  %v4938_v8 = vld [vmem:[%s5423_s24 + $0x2e4] sm:$0xf] }
  0xbf   : > { %2770 = vmatpush.bf16.msrb.mxu3 %v4334_v21  ;;  %2737 = vmatpush.bf16.msra.mxu1 %v3854_v24  ;;  %v4590_v21 = vor.u32 %v5068_v19, %v4589_v18  ;;  %v4397_v24 = vld [vmem:[%s5423_s24 + $0x560] sm:$0xf]  ;;  %v4031_v59 = vld [vmem:[%s5423_s24 + $0x290] sm:$0xf0] }
  0xc0   : > { %v4398_v27 = vor.u32 %v5020_v26, %v4397_v24  ;;  %v4509_v19 = vld [vmem:[%s5423_s24 + $0x640] sm:$0xf]  ;;  %v3791_v24 = vld [vmem:[%s5423_s24 + $0xb0] sm:$0xf0]  ;;  %v5088_v26 = vld [vmem:[%s5423_s24 + $0x78c] sm:$0xf0] }
  0xc1   : > { %2751 = vmatpush.bf16.msra.mxu2 %v3966_v16  ;;  %2762 = vmatpush.bf16.msra.mxu0 %v4126_v20  ;;  %v5048_v20 = vld [vmem:[%s5423_s24 + $0x64c] sm:$0xf0] }
  0xc3   : > { %2771 = vmatpush.bf16.msrb.mxu3 %v4318_v25  ;;  %2738 = vmatpush.bf16.msra.mxu1 %v3838_v34  ;;  %v4238_v25 = vor.u32 %v4980_v23, %v4237_v22  ;;  %v4221_v34 = vld [vmem:[%s5423_s24 + $0x400] sm:$0xf]  ;;  %v4866_v23 = vld [vmem:[%s5423_s24 + $0xa4] sm:$0xf] }
  0xc4   : > { %v4222_v37 = vor.u32 %v4976_v35, %v4221_v34  ;;  %v4653_v34 = vld [vmem:[%s5423_s24 + $0x760] sm:$0xf] }
  0xc5   : > { %2796 = vmatpush.bf16.msrb.mxu2 %v4590_v21  ;;  %2763 = vmatpush.bf16.msra.mxu0 %v4110_v30  ;;  %v4669_v21 = vld [vmem:[%s5423_s24 + $0x780] sm:$0xf]  ;;  %v3951_v30 = vld [vmem:[%s5423_s24 + $0x1f0] sm:$0xf0] }
  0xc6   : > { %v4670_v31 = vor.u32 %v5088_v26, %v4669_v21  ;;  %v4934_v26 = vld [vmem:[%s5423_s24 + $0x2c4] sm:$0xf] }
  0xc7   : > { %2772 = vmatpush.bf16.msrb.mxu3 %v4302_v38  ;;  %2783 = vmatpush.bf16.msrb.mxu1 %v4462_v43  ;;  %v5016_v38 = vld [vmem:[%s5423_s24 + $0x54c] sm:$0xf0] }
  0xc8   : > { %v4382_v40 = vor.u32 %v5016_v38, %v4381_v36  ;;  %v4944_v43 = vld [vmem:[%s5423_s24 + $0x30c] sm:$0xf0]  ;;  %v3954_v38 = vor.u32 %v4906_v29, %v3951_v30 }
  0xc9   : > { %2797 = vmatpush.bf16.msrb.mxu2 %v4574_v33  ;;  %v4094_v44 = vor.u32 %v4944_v43, %v4093_v42  ;;  %v5044_v33 = vld [vmem:[%s5423_s24 + $0x62c] sm:$0xf0]  ;;  %v3794_v42 = vor.u32 %v4866_v23, %v3791_v24  ;;  %v4902_v43 = vld [vmem:[%s5423_s24 + $0x1c4] sm:$0xf] }
  0xca   : > { %v4494_v36 = vor.u32 %v5044_v33, %v4493_v32  ;;  %v4886_v32 = vld [vmem:[%s5423_s24 + $0x144] sm:$0xf]  ;;  %v3871_v33 = vld [vmem:[%s5423_s24 + $0x150] sm:$0xf0] }
  0xcb   : > { %2773 = vmatpush.bf16.msrb.mxu3 %v4286_v52  ;;  %2784 = vmatpush.bf16.msrb.mxu1 %v4446_v53  ;;  %v4718_v52 = vor.u32 %v5100_v49, %v4717_v47  ;;  %v4366_v53 = vor.u32 %v5012_v51, %v4365_v50  ;;  %v3775_v47 = vld [vmem:[%s5423_s24 + $0x90] sm:$0xf0]  ;;  %v4477_v49 = vld [vmem:[%s5423_s24 + $0x600] sm:$0xf]  ;;  %v5040_v50 = vld [vmem:[%s5423_s24 + $0x60c] sm:$0xf0] }
  0xcc   : > { %2764 = vmatpush.bf16.msra.mxu0 %v4094_v44  ;;  %v3935_v44 = vld [vmem:[%s5423_s24 + $0x1d0] sm:$0xf0]  ;;  %v4637_v51 = vld [vmem:[%s5423_s24 + $0x740] sm:$0xf] }
  0xcd   : > { %2798 = vmatpush.bf16.msrb.mxu2 %v4558_v48  ;;  %v3938_v48 = vor.u32 %v4902_v43, %v3935_v44  ;;  %v4930_v43 = vld [vmem:[%s5423_s24 + $0x2a4] sm:$0xf]  ;;  %v4047_v44 = vld [vmem:[%s5423_s24 + $0x2b0] sm:$0xf0] }
  0xcf   : > { %2774 = vmatpush.bf16.msrb.mxu3 %v4270_v0  ;;  %2785 = vmatpush.bf16.msrb.mxu1 %v4430_v4  ;;  %v958_v39 = vpop.f32.mrf.mxu1  ;;  %v5008_v0 = vld [vmem:[%s5423_s24 + $0x50c] sm:$0xf0]  ;;  %v4702_v4 = vor.u32 %v5096_v62, %v4701_v60  ;;  %v4621_v62 = vld [vmem:[%s5423_s24 + $0x720] sm:$0xf] }
  0xd0   : > { %2809 = vmatpush.bf16.msrb.mxu0 %v4718_v52  ;;  %v4350_v41 = vor.u32 %v5008_v0, %v4349_v63  ;;  %v3778_v52 = vor.u32 %v4862_v46, %v3775_v47  ;;  %v5076_v63 = vld [vmem:[%s5423_s24 + $0x72c] sm:$0xf0]  ;;  %v4882_v47 = vld [vmem:[%s5423_s24 + $0x124] sm:$0xf] }
  0xd1   : > { %v945_v54 = vpop.f32.mrf.mxu0  ;;  %2799 = vmatpush.bf16.msrb.mxu2 %v4542_v61 }
  0xd2   : > { %v959_v57 = vadd.f32 %v958_v39, %v945_v54  ;;  %v3919_v54 = vld [vmem:[%s5423_s24 + $0x1b0] sm:$0xf0] }
  0xd3   : > { %2775 = vmatpush.bf16.msrb.mxu3 %v4254_v12  ;;  %2786 = vmatpush.bf16.msrb.mxu1 %v4414_v13  ;;  %v5092_v12 = vld [vmem:[%s5423_s24 + $0x7ac] sm:$0xf0] }
  0xd4   : > { %v3698_v1 = vadd.f32 -1.0, %v959_v57  ;;  %2810 = vmatpush.bf16.msrb.mxu0 %v4702_v4  ;;  %v4686_v16 = vor.u32 %v5092_v12, %v4685_v11  ;;  %v5080_v57 = vld [vmem:[%s5423_s24 + $0x74c] sm:$0xf0]  ;;  %v3903_v4 = vld [vmem:[%s5423_s24 + $0x190] sm:$0xf0] }
  0xd5   : > { %v984_v55 = vpop.f32.mrf.mxu3  ;;  %2800 = vmatpush.bf16.msrb.mxu2 %v4526_v10  ;;  %v4638_v60 = vor.u32 %v5080_v57, %v4637_v51  ;;  %v3906_v10 = vor.u32 %v4894_v3, %v3903_v4  ;;  %v4079_v11 = vld [vmem:[%s5423_s24 + $0x2f0] sm:$0xf0]  ;;  %v4890_v12 = vld [vmem:[%s5423_s24 + $0x164] sm:$0xf]  ;;  %v4050_v51 = vor.u32 %v4930_v43, %v4047_v44 }
  0xd6   : > { %v1152_v6 = vmax.f32 %v3698_v1, 0.0  ;;  %v4082_v21 = vor.u32 %v4938_v8, %v4079_v11  ;;  %v4922_v3 = vld [vmem:[%s5423_s24 + $0x264] sm:$0xf]  ;;  %v4015_v4 = vld [vmem:[%s5423_s24 + $0x270] sm:$0xf0] }
  0xd7   : > { %2776 = vmatpush.bf16.msrb.mxu3 %v4238_v25  ;;  %2787 = vmatpush.bf16.msrb.mxu1 %v4398_v27  ;;  %v960_v5 = vpop.f32.mrf.mxu1  ;;  %v971_v56 = vpop.f32.mrf.mxu2  ;;  %v4510_v25 = vor.u32 %v5048_v20, %v4509_v19  ;;  %v3727_v19 = vld [vmem:[%s5423_s24 + $0x30] sm:$0xf0] }
  0xd8   : > { %v5578_v13 = vpack.c.bf16 %v1152_v6, %v1152_v6  ;;  %v985_v17 = vadd.f32 %v984_v55, %v971_v56  ;;  %2811 = vmatpush.bf16.msrb.mxu0 %v4686_v16  ;;  %v4478_v55 = vor.u32 %v5040_v50, %v4477_v49  ;;  %v4854_v6 = vld [vmem:[%s5423_s24 + $0x44] sm:$0xf]  ;;  %v5072_v16 = vld [vmem:[%s5423_s24 + $0x70c] sm:$0xf0]  ;;  %v4159_v8 = vld [vmem:[%s5423_s24 + $0x390] sm:$0xf0] }
  0xd9   : > { %v947_v18 = vpop.f32.mrf.mxu0  ;;  %2801 = vmatpush.bf16.msrb.mxu2 %v4510_v25  ;;  %v3746_v56 = vor.u32 %v4854_v6, %v3743_v7  ;;  %v4606_v20 = vor.u32 %v5072_v16, %v4605_v15  ;;  %v3890_v25 = vor.u32 %v4890_v12, %v3887_v14  ;;  %v4018_v6 = vor.u32 %v4922_v3, %v4015_v4  ;;  %v4958_v7 = vld [vmem:[%s5423_s24 + $0x384] sm:$0xf]  ;;  %v4143_v14 = vld [vmem:[%s5423_s24 + $0x370] sm:$0xf0] }
  0xda   : > { %2726 = vmatmul.bf16.vlgmr.msra.gmra.mxu3 %v5578_v13  ;;  %v3699_v27 = vadd.f32 -1.0, %v985_v17  ;;  %v4850_v18 = vld [vmem:[%s5423_s24 + $0x24] sm:$0xf]  ;;  %v4162_v11 = vor.u32 %v4958_v7, %v4159_v8  ;;  %v3983_v16 = vld [vmem:[%s5423_s24 + $0x230] sm:$0xf0] }
  0xdb   : > { %2777 = vmatpush.bf16.msrb.mxu3 %v4222_v37  ;;  %2788 = vmatpush.bf16.msrb.mxu1 %v4382_v40  ;;  %v5084_v37 = vld [vmem:[%s5423_s24 + $0x76c] sm:$0xf0]  ;;  %v4914_v15 = vld [vmem:[%s5423_s24 + $0x224] sm:$0xf]  ;;  %v4271_v7 = vld [vmem:[%s5423_s24 + $0x470] sm:$0xf0] }
  0xdc   : > { %v1153_v35 = vmax.f32 %v3699_v27, 0.0  ;;  %2812 = vmatpush.bf16.msrb.mxu0 %v4670_v31  ;;  %v4654_v39 = vor.u32 %v5084_v37, %v4653_v34  ;;  %v4063_v27 = vld [vmem:[%s5423_s24 + $0x2d0] sm:$0xf0]  ;;  %v3730_v31 = vor.u32 %v4850_v18, %v3727_v19  ;;  %v4846_v34 = vld [vmem:[%s5423_s24 + $0x4] sm:$0xf] }
  0xdd   : > { %v986_v22 = vpop.f32.mrf.mxu3  ;;  %2802 = vmatpush.bf16.msrb.mxu2 %v4494_v36  ;;  %v4066_v37 = vor.u32 %v4934_v26, %v4063_v27  ;;  %v4950_v26 = vld [vmem:[%s5423_s24 + $0x344] sm:$0xf]  ;;  %v4127_v27 = vld [vmem:[%s5423_s24 + $0x350] sm:$0xf0] }
  0xde   : > { %v5595_v40 = vpack.c.bf16 %v1153_v35, %v1153_v35  ;;  %v3711_v35 = vld [vmem:[%s5423_s24 + $0x10] sm:$0xf0] }
  0xdf   : > { %2789 = vmatpush.bf16.msrb.mxu1 %v4366_v53  ;;  %2822 = vmatpush.bf16.msra.mxu3 %v3826_v9  ;;  %v973_v45 = vpop.f32.mrf.mxu2  ;;  %v4898_v53 = vld [vmem:[%s5423_s24 + $0x1a4] sm:$0xf]  ;;  %v3714_v46 = vor.u32 %v4846_v34, %v3711_v35 }
  0xe0   : > { %2739 = vmatmul.bf16.vlgmr.msra.gmra.mxu1 %v5595_v40  ;;  %2813 = vmatpush.bf16.msrb.mxu0 %v4654_v39  ;;  %v3922_v61 = vor.u32 %v4898_v53, %v3919_v54  ;;  %v4207_v39 = vld [vmem:[%s5423_s24 + $0x3f0] sm:$0xf0]  ;;  %v4946_v35 = vld [vmem:[%s5423_s24 + $0x324] sm:$0xf] }
  0xe1   : > { %2803 = vmatpush.bf16.msrb.mxu2 %v4478_v55  ;;  %v4191_v53 = vld [vmem:[%s5423_s24 + $0x3d0] sm:$0xf0] }
  0xe3   : > { %2790 = vmatpush.bf16.msrb.mxu1 %v4350_v41  ;;  %2823 = vmatpush.bf16.msra.mxu3 %v3810_v28  ;;  %v4622_v41 = vor.u32 %v5076_v63, %v4621_v62  ;;  %v4034_v63 = vor.u32 %v4926_v58, %v4031_v59 }
  0xe4   : > { %2814 = vmatpush.bf16.msrb.mxu0 %v4638_v60  ;;  %v4878_v60 = vld [vmem:[%s5423_s24 + $0x104] sm:$0xf] }
  0xe7   : > { %2835 = vmatpush.bf16.msra.mxu1 %v3954_v38  ;;  %2824 = vmatpush.bf16.msra.mxu3 %v3794_v42  ;;  %v4970_v38 = vld [vmem:[%s5423_s24 + $0x3e4] sm:$0xf]  ;;  %v3874_v42 = vor.u32 %v4886_v32, %v3871_v33  ;;  %v4130_v32 = vor.u32 %v4950_v26, %v4127_v27  ;;  %v4239_v27 = vld [vmem:[%s5423_s24 + $0x430] sm:$0xf0] }
  0xe8   : > { %2815 = vmatpush.bf16.msrb.mxu0 %v4622_v41  ;;  %v4210_v49 = vor.u32 %v4970_v38, %v4207_v39  ;;  %v4998_v39 = vld [vmem:[%s5423_s24 + $0x4c4] sm:$0xf] }
  0xe9   : > { %v1010_v1 = vpop.f32.mrf.mxu3  ;;  %v4978_v26 = vld [vmem:[%s5423_s24 + $0x424] sm:$0xf] }
  0xeb   : > { %2836 = vmatpush.bf16.msra.mxu1 %v3938_v48  ;;  %v997_v0 = vpop.f32.mrf.mxu1  ;;  %2825 = vmatpush.bf16.msra.mxu3 %v3778_v52  ;;  %v3855_v48 = vld [vmem:[%s5423_s24 + $0x130] sm:$0xf0]  ;;  %v4966_v52 = vld [vmem:[%s5423_s24 + $0x3c4] sm:$0xf] }
  0xec   : > { %v1011_v5 = vadd.f32 %v1010_v1, %v997_v0  ;;  %2816 = vmatpush.bf16.msrb.mxu0 %v4606_v20  ;;  %v3858_v57 = vor.u32 %v4882_v47, %v3855_v48  ;;  %v4194_v62 = vor.u32 %v4966_v52, %v4191_v53  ;;  %v4962_v0 = vld [vmem:[%s5423_s24 + $0x3a4] sm:$0xf]  ;;  %v4175_v1 = vld [vmem:[%s5423_s24 + $0x3b0] sm:$0xf0] }
  0xed   : > { %v4463_v47 = vld [vmem:[%s5423_s24 + $0x5f0] sm:$0xf0]  ;;  %v4942_v52 = vld [vmem:[%s5423_s24 + $0x304] sm:$0xf] }
  0xee   : > { %v3700_v9 = vadd.f32 -1.0, %v1011_v5  ;;  %v4178_v5 = vor.u32 %v4962_v0, %v4175_v1  ;;  %v4095_v53 = vld [vmem:[%s5423_s24 + $0x310] sm:$0xf0]  ;;  %v4990_v1 = vld [vmem:[%s5423_s24 + $0x484] sm:$0xf] }
  0xef   : > { %2837 = vmatpush.bf16.msra.mxu1 %v3922_v61  ;;  %2826 = vmatpush.bf16.msra.mxu3 %v3762_v2  ;;  %v1036_v24 = vpop.f32.mrf.mxu2  ;;  %v3839_v61 = vld [vmem:[%s5423_s24 + $0x110] sm:$0xf0]  ;;  %v4098_v59 = vor.u32 %v4942_v52, %v4095_v53 }
  0xf0   : > { %v1154_v17 = vmax.f32 %v3700_v9, 0.0  ;;  %v3842_v2 = vor.u32 %v4878_v60, %v3839_v61  ;;  %v4918_v9 = vld [vmem:[%s5423_s24 + $0x244] sm:$0xf] }
  0xf1   : > { %v1023_v23 = vpop.f32.mrf.mxu0  ;;  %v1012_v30 = vpop.f32.mrf.mxu3 }
  0xf2   : > { %v5624_v22 = vpack.c.bf16 %v1154_v17, %v1154_v17  ;;  %v1037_v28 = vadd.f32 %v1036_v24, %v1023_v23  ;;  %v4335_v24 = vld [vmem:[%s5423_s24 + $0x4f0] sm:$0xf0] }
  0xf3   : > { %2838 = vmatpush.bf16.msra.mxu1 %v3906_v10  ;;  %v999_v29 = vpop.f32.mrf.mxu1  ;;  %2827 = vmatpush.bf16.msra.mxu3 %v3746_v56  ;;  %v3999_v10 = vld [vmem:[%s5423_s24 + $0x250] sm:$0xf0]  ;;  %v4954_v56 = vld [vmem:[%s5423_s24 + $0x364] sm:$0xf] }
  0xf4   : > { %2752 = vmatmul.bf16.vlgmr.msra.gmra.mxu2 %v5624_v22  ;;  %v3701_v36 = vadd.f32 -1.0, %v1037_v28  ;;  %v4002_v12 = vor.u32 %v4918_v9, %v3999_v10  ;;  %v4146_v23 = vor.u32 %v4954_v56, %v4143_v14  ;;  %v4910_v29 = vld [vmem:[%s5423_s24 + $0x204] sm:$0xf]  ;;  %v3967_v30 = vld [vmem:[%s5423_s24 + $0x210] sm:$0xf0] }
  0xf5   : > { %2848 = vmatpush.bf16.msra.mxu2 %v4082_v21  ;;  %v5002_v21 = vld [vmem:[%s5423_s24 + $0x4e4] sm:$0xf]  ;;  %v3970_v34 = vor.u32 %v4910_v29, %v3967_v30  ;;  %v4415_v56 = vld [vmem:[%s5423_s24 + $0x590] sm:$0xf0] }
  0xf6   : > { %v1155_v45 = vmax.f32 %v3701_v36, 0.0  ;;  %v4338_v33 = vor.u32 %v5002_v21, %v4335_v24  ;;  %v4111_v36 = vld [vmem:[%s5423_s24 + $0x330] sm:$0xf0] }
  0xf7   : > { %2839 = vmatpush.bf16.msra.mxu1 %v3890_v25  ;;  %2828 = vmatpush.bf16.msra.mxu3 %v3730_v31  ;;  %v1038_v55 = vpop.f32.mrf.mxu2  ;;  %v3986_v25 = vor.u32 %v4914_v15, %v3983_v16  ;;  %v4114_v48 = vor.u32 %v4946_v35, %v4111_v36  ;;  %v4982_v15 = vld [vmem:[%s5423_s24 + $0x444] sm:$0xf]  ;;  %v4255_v16 = vld [vmem:[%s5423_s24 + $0x450] sm:$0xf0] }
  0xf8   : > { %v5639_v50 = vpack.c.bf16 %v1155_v45, %v1155_v45  ;;  %v4303_v55 = vld [vmem:[%s5423_s24 + $0x4b0] sm:$0xf0]  ;;  %v4258_v21 = vor.u32 %v4982_v15, %v4255_v16 }
  0xf9   : > { %2849 = vmatpush.bf16.msra.mxu2 %v4066_v37  ;;  %v1025_v54 = vpop.f32.mrf.mxu0  ;;  %v4399_v24 = vld [vmem:[%s5423_s24 + $0x570] sm:$0xf0] }
  0xfa   : > { %2765 = vmatmul.bf16.vlgmr.msra.gmra.mxu0 %v5639_v50  ;;  %v4994_v54 = vld [vmem:[%s5423_s24 + $0x4a4] sm:$0xf] }
  0xfb   : > { %2840 = vmatpush.bf16.msra.mxu1 %v3874_v42  ;;  %2829 = vmatpush.bf16.msra.mxu3 %v3714_v46  ;;  %v4319_v42 = vld [vmem:[%s5423_s24 + $0x4d0] sm:$0xf0]  ;;  %v5034_v46 = vld [vmem:[%s5423_s24 + $0x5e4] sm:$0xf]  ;;  %v4306_v61 = vor.u32 %v4994_v54, %v4303_v55 }
  0xfc   : > { %2861 = vmatpush.bf16.msra.mxu0 %v4210_v49  ;;  %v4466_v58 = vor.u32 %v5034_v46, %v4463_v47  ;;  %v3829_v46 = vld [vmem:[%s5423_s24 + $0xe8] sm:$0xf]  ;;  %v5098_v54 = vld [vmem:[%s5423_s24 + $0x7e4] sm:$0xf]  ;;  %v4719_v55 = vld [vmem:[%s5423_s24 + $0x7f0] sm:$0xf0] }
  0xfd   : > { %2850 = vmatpush.bf16.msra.mxu2 %v4050_v51  ;;  %v4322_v51 = vor.u32 %v4998_v39, %v4319_v42  ;;  %v5014_v39 = vld [vmem:[%s5423_s24 + $0x544] sm:$0xf]  ;;  %v4383_v42 = vld [vmem:[%s5423_s24 + $0x550] sm:$0xf0] }
  0xfe   : > { %v4386_v53 = vor.u32 %v5014_v39, %v4383_v42 }
  0xff   : > { %2841 = vmatpush.bf16.msra.mxu1 %v3858_v57 }
 0x100   : > { %2862 = vmatpush.bf16.msra.mxu0 %v4194_v62  ;;  %v5030_v62 = vld [vmem:[%s5423_s24 + $0x5c4] sm:$0xf] }
 0x101   : > { %2851 = vmatpush.bf16.msra.mxu2 %v4034_v63  ;;  %v4447_v63 = vld [vmem:[%s5423_s24 + $0x5d0] sm:$0xf0] }
 0x102   : > { %v4450_v3 = vor.u32 %v5030_v62, %v4447_v63 }
 0x103   : > { %v1062_v41 = vpop.f32.mrf.mxu1  ;;  %2842 = vmatpush.bf16.msra.mxu1 %v3842_v2  ;;  %v4287_v2 = vld [vmem:[%s5423_s24 + $0x490] sm:$0xf0] }
 0x104   : > { %2863 = vmatpush.bf16.msra.mxu0 %v4178_v5  ;;  %v4290_v4 = vor.u32 %v4990_v1, %v4287_v2  ;;  %v4431_v5 = vld [vmem:[%s5423_s24 + $0x5b0] sm:$0xf0]  ;;  %v3813_v1 = vld [vmem:[%s5423_s24 + $0xc8] sm:$0xf]  ;;  %v4873_v2 = vld [vmem:[%s5423_s24 + $0xd4] sm:$0xf0] }
 0x105   : > { %2852 = vmatpush.bf16.msra.mxu2 %v4018_v6  ;;  %v4986_v6 = vld [vmem:[%s5423_s24 + $0x464] sm:$0xf] }
 0x108   : > { %2864 = vmatpush.bf16.msra.mxu0 %v4162_v11  ;;  %v4274_v11 = vor.u32 %v4986_v6, %v4271_v7  ;;  %v4543_v6 = vld [vmem:[%s5423_s24 + $0x690] sm:$0xf0]  ;;  %v5094_v7 = vld [vmem:[%s5423_s24 + $0x7c4] sm:$0xf] }
 0x109   : > { %v1049_v17 = vpop.f32.mrf.mxu3  ;;  %v1088_v18 = vpop.f32.mrf.mxu0  ;;  %2853 = vmatpush.bf16.msra.mxu2 %v4002_v12  ;;  %v5022_v12 = vld [vmem:[%s5423_s24 + $0x584] sm:$0xf] }
 0x10a   : > { %v1063_v19 = vadd.f32 %v1062_v41, %v1049_v17  ;;  %v5026_v41 = vld [vmem:[%s5423_s24 + $0x5a4] sm:$0xf] }
 0x10b   : > { %v1064_v20 = vpop.f32.mrf.mxu1  ;;  %v4434_v9 = vor.u32 %v5026_v41, %v4431_v5 }
 0x10c   : > { %v3702_v28 = vadd.f32 -1.0, %v1063_v19  ;;  %2865 = vmatpush.bf16.msra.mxu0 %v4146_v23  ;;  %v5066_v19 = vld [vmem:[%s5423_s24 + $0x6e4] sm:$0xf]  ;;  %v4591_v20 = vld [vmem:[%s5423_s24 + $0x6f0] sm:$0xf0] }
 0x10d   : > { %2854 = vmatpush.bf16.msra.mxu2 %v3986_v25  ;;  %v5018_v23 = vld [vmem:[%s5423_s24 + $0x564] sm:$0xf] }
 0x10e   : > { %v1156_v31 = vmax.f32 %v3702_v28, 0.0  ;;  %v4594_v28 = vor.u32 %v5066_v19, %v4591_v20  ;;  %v5050_v19 = vld [vmem:[%s5423_s24 + $0x664] sm:$0xf] }
 0x10f   : > { %v1075_v38 = vpop.f32.mrf.mxu2 }
 0x110   : > { %v5668_v37 = vpack.c.bf16 %v1156_v31, %v1156_v31  ;;  %v1089_v43 = vadd.f32 %v1088_v18, %v1075_v38  ;;  %2866 = vmatpush.bf16.msra.mxu0 %v4130_v32  ;;  %v4418_v18 = vor.u32 %v5022_v12, %v4415_v56  ;;  %v4402_v32 = vor.u32 %v5018_v23, %v4399_v24  ;;  %v3957_v56 = vld [vmem:[%s5423_s24 + $0x1e8] sm:$0xf]  ;;  %v5090_v23 = vld [vmem:[%s5423_s24 + $0x7a4] sm:$0xf]  ;;  %v4687_v24 = vld [vmem:[%s5423_s24 + $0x7b0] sm:$0xf0] }
 0x111   : > { %v1051_v44 = vpop.f32.mrf.mxu3  ;;  %v1090_v45 = vpop.f32.mrf.mxu0  ;;  %2855 = vmatpush.bf16.msra.mxu2 %v3970_v34  ;;  %v4575_v34 = vld [vmem:[%s5423_s24 + $0x6d0] sm:$0xf0]  ;;  %v4242_v38 = vor.u32 %v4978_v26, %v4239_v27  ;;  %v3814_v12 = vor.u32 %v4873_v2, %v3813_v1  ;;  %v3941_v27 = vld [vmem:[%s5423_s24 + $0x1c8] sm:$0xf]  ;;  %v5078_v2 = vld [vmem:[%s5423_s24 + $0x744] sm:$0xf] }
 0x112   : > { %2778 = vmatmul.bf16.vlgmr.msrb.gmra.mxu3 %v5668_v37  ;;  %v3703_v49 = vadd.f32 -1.0, %v1089_v43  ;;  %v4974_v44 = vld [vmem:[%s5423_s24 + $0x404] sm:$0xf]  ;;  %v4223_v45 = vld [vmem:[%s5423_s24 + $0x410] sm:$0xf0] }
 0x113   : > { %2874 = vmatpush.bf16.msrb.mxu3 %v4338_v33  ;;  %v5062_v33 = vld [vmem:[%s5423_s24 + $0x6c4] sm:$0xf]  ;;  %v4479_v1 = vld [vmem:[%s5423_s24 + $0x610] sm:$0xf0] }
 0x114   : > { %v1157_v57 = vmax.f32 %v3703_v49, 0.0  ;;  %2867 = vmatpush.bf16.msra.mxu0 %v4114_v48  ;;  %v4578_v47 = vor.u32 %v5062_v33, %v4575_v34  ;;  %v4877_v48 = vld [vmem:[%s5423_s24 + $0xf4] sm:$0xf0]  ;;  %v5058_v49 = vld [vmem:[%s5423_s24 + $0x6a4] sm:$0xf] }
 0x115   : > { %v3830_v62 = vor.u32 %v4877_v48, %v3829_v46  ;;  %v4865_v33 = vld [vmem:[%s5423_s24 + $0x94] sm:$0xf0]  ;;  %v5046_v34 = vld [vmem:[%s5423_s24 + $0x644] sm:$0xf] }
 0x116   : > { %v5679_v60 = vpack.c.bf16 %v1157_v57, %v1157_v57  ;;  %v4226_v57 = vor.u32 %v4974_v44, %v4223_v45  ;;  %v4901_v44 = vld [vmem:[%s5423_s24 + $0x1b4] sm:$0xf0] }
 0x117   : > { %2875 = vmatpush.bf16.msrb.mxu3 %v4322_v51  ;;  %v1077_v0 = vpop.f32.mrf.mxu2  ;;  %v4559_v51 = vld [vmem:[%s5423_s24 + $0x6b0] sm:$0xf0]  ;;  %v4861_v48 = vld [vmem:[%s5423_s24 + $0x74] sm:$0xf0] }
 0x118   : > { %2791 = vmatmul.bf16.vlgmr.msrb.gmra.mxu1 %v5679_v60  ;;  %2868 = vmatpush.bf16.msra.mxu0 %v4098_v59  ;;  %v4367_v59 = vld [vmem:[%s5423_s24 + $0x530] sm:$0xf0]  ;;  %v4562_v63 = vor.u32 %v5058_v49, %v4559_v51  ;;  %v4722_v0 = vor.u32 %v5098_v54, %v4719_v55  ;;  %v5042_v49 = vld [vmem:[%s5423_s24 + $0x624] sm:$0xf] }
 0x119   : > { %2887 = vmatpush.bf16.msrb.mxu1 %v4466_v58  ;;  %v5010_v58 = vld [vmem:[%s5423_s24 + $0x524] sm:$0xf]  ;;  %v4495_v51 = vld [vmem:[%s5423_s24 + $0x630] sm:$0xf0] }
 0x11a   : > { %v4370_v5 = vor.u32 %v5010_v58, %v4367_v59  ;;  %v4897_v58 = vld [vmem:[%s5423_s24 + $0x194] sm:$0xf0]  ;;  %v4498_v59 = vor.u32 %v5042_v49, %v4495_v51  ;;  %v4037_v51 = vld [vmem:[%s5423_s24 + $0x288] sm:$0xf] }
 0x11b   : > { %2876 = vmatpush.bf16.msrb.mxu3 %v4306_v61  ;;  %v5001_v49 = vld [vmem:[%s5423_s24 + $0x4d4] sm:$0xf0] }
 0x11d   : > { %2888 = vmatpush.bf16.msrb.mxu1 %v4450_v3  ;;  %v5054_v3 = vld [vmem:[%s5423_s24 + $0x684] sm:$0xf] }
 0x11e   : > { %v4546_v15 = vor.u32 %v5054_v3, %v4543_v6  ;;  %v4639_v3 = vld [vmem:[%s5423_s24 + $0x750] sm:$0xf0]  ;;  %v4941_v6 = vld [vmem:[%s5423_s24 + $0x2f4] sm:$0xf0] }
 0x11f   : > { %2877 = vmatpush.bf16.msrb.mxu3 %v4290_v4 }
 0x121   : > { %v1114_v8 = vpop.f32.mrf.mxu3  ;;  %2889 = vmatpush.bf16.msrb.mxu1 %v4434_v9 }
 0x122   : > { %2830 = vmatmul.bf16.vlgmr.msra.gmra.mxu3 %v5578_v13 }
 0x123   : > { %v1101_v10 = vpop.f32.mrf.mxu1  ;;  %2878 = vmatpush.bf16.msrb.mxu3 %v4274_v11  ;;  %v4351_v11 = vld [vmem:[%s5423_s24 + $0x510] sm:$0xf0] }
 0x124   : > { %v1115_v14 = vadd.f32 %v1114_v8, %v1101_v10  ;;  %v4703_v8 = vld [vmem:[%s5423_s24 + $0x7d0] sm:$0xf0]  ;;  %v5006_v10 = vld [vmem:[%s5423_s24 + $0x504] sm:$0xf] }
 0x125   : > { %2890 = vmatpush.bf16.msrb.mxu1 %v4418_v18  ;;  %v4706_v16 = vor.u32 %v5094_v7, %v4703_v8  ;;  %v4869_v18 = vld [vmem:[%s5423_s24 + $0xb4] sm:$0xf0]  ;;  %v4354_v20 = vor.u32 %v5006_v10, %v4351_v11  ;;  %v3893_v8 = vld [vmem:[%s5423_s24 + $0x168] sm:$0xf]  ;;  %v4642_v11 = vor.u32 %v5078_v2, %v4639_v3 }
 0x126   : > { %v3704_v17 = vadd.f32 -1.0, %v1115_v14  ;;  %v4909_v14 = vld [vmem:[%s5423_s24 + $0x1f4] sm:$0xf0] }
 0x127   : > { %v1140_v31 = vpop.f32.mrf.mxu2  ;;  %2879 = vmatpush.bf16.msrb.mxu3 %v4258_v21  ;;  %v4527_v21 = vld [vmem:[%s5423_s24 + $0x670] sm:$0xf0]  ;;  %v4997_v2 = vld [vmem:[%s5423_s24 + $0x4b4] sm:$0xf0] }
 0x128   : > { %v1158_v25 = vmax.f32 %v3704_v17, 0.0  ;;  %2843 = vmatmul.bf16.vlgmr.msra.gmra.mxu1 %v5595_v40  ;;  %v3797_v17 = vld [vmem:[%s5423_s24 + $0xa8] sm:$0xf] }
 0x129   : > { %v1116_v30 = vpop.f32.mrf.mxu3  ;;  %v1127_v36 = vpop.f32.mrf.mxu0  ;;  %2891 = vmatpush.bf16.msrb.mxu1 %v4402_v32  ;;  %v3798_v26 = vor.u32 %v4869_v18, %v3797_v17  ;;  %v3781_v32 = vld [vmem:[%s5423_s24 + $0x88] sm:$0xf] }
 0x12a   : > { %v5701_v29 = vpack.c.bf16 %v1158_v25, %v1158_v25  ;;  %v1141_v43 = vadd.f32 %v1140_v31, %v1127_v36  ;;  %v3958_v25 = vor.u32 %v4909_v14, %v3957_v56  ;;  %v4530_v30 = vor.u32 %v5050_v19, %v4527_v21  ;;  %v5086_v36 = vld [vmem:[%s5423_s24 + $0x784] sm:$0xf]  ;;  %v4853_v56 = vld [vmem:[%s5423_s24 + $0x34] sm:$0xf0]  ;;  %v4069_v18 = vld [vmem:[%s5423_s24 + $0x2c8] sm:$0xf] }
 0x12b   : > { %v1103_v35 = vpop.f32.mrf.mxu1  ;;  %2880 = vmatpush.bf16.msrb.mxu3 %v4242_v38  ;;  %v4690_v31 = vor.u32 %v5090_v23, %v4687_v24  ;;  %v4671_v38 = vld [vmem:[%s5423_s24 + $0x790] sm:$0xf0]  ;;  %v3782_v42 = vor.u32 %v4865_v33, %v3781_v32  ;;  %v4937_v19 = vld [vmem:[%s5423_s24 + $0x2d4] sm:$0xf0]  ;;  %v3717_v21 = vld [vmem:[%s5423_s24 + $0x8] sm:$0xf] }
 0x12c   : > { %2804 = vmatmul.bf16.vlgmr.msrb.gmra.mxu2 %v5701_v29  ;;  %v3705_v52 = vadd.f32 -1.0, %v1141_v43  ;;  %v4511_v35 = vld [vmem:[%s5423_s24 + $0x650] sm:$0xf0]  ;;  %v3925_v43 = vld [vmem:[%s5423_s24 + $0x1a8] sm:$0xf]  ;;  %v4674_v46 = vor.u32 %v5086_v36, %v4671_v38 }
 0x12d   : > { %2900 = vmatpush.bf16.msrb.mxu2 %v4594_v28  ;;  %2892 = vmatpush.bf16.msrb.mxu1 %v4386_v53  ;;  %v4905_v28 = vld [vmem:[%s5423_s24 + $0x1d4] sm:$0xf0]  ;;  %v4514_v45 = vor.u32 %v5046_v34, %v4511_v35  ;;  %v4655_v53 = vld [vmem:[%s5423_s24 + $0x770] sm:$0xf0]  ;;  %v3926_v54 = vor.u32 %v4901_v44, %v3925_v43  ;;  %v3877_v23 = vld [vmem:[%s5423_s24 + $0x148] sm:$0xf] }
 0x12e   : > { %v1159_v61 = vmax.f32 %v3705_v52, 0.0  ;;  %v3942_v39 = vor.u32 %v4905_v28, %v3941_v27  ;;  %v5082_v52 = vld [vmem:[%s5423_s24 + $0x764] sm:$0xf]  ;;  %v4889_v24 = vld [vmem:[%s5423_s24 + $0x154] sm:$0xf0] }
 0x12f   : > { %v1142_v41 = vpop.f32.mrf.mxu2  ;;  %2881 = vmatpush.bf16.msrb.mxu3 %v4226_v57  ;;  %v3909_v57 = vld [vmem:[%s5423_s24 + $0x188] sm:$0xf]  ;;  %v5005_v28 = vld [vmem:[%s5423_s24 + $0x4f4] sm:$0xf0]  ;;  %v4607_v32 = vld [vmem:[%s5423_s24 + $0x710] sm:$0xf0]  ;;  %v3878_v34 = vor.u32 %v4889_v24, %v3877_v23 }
 0x130   : > { %v5722_v4 = vpack.c.bf16 %v1159_v61, %v1159_v61  ;;  %v4658_v61 = vor.u32 %v5082_v52, %v4655_v53  ;;  %v3910_v41 = vor.u32 %v4897_v58, %v3909_v57  ;;  %v4341_v27 = vld [vmem:[%s5423_s24 + $0x4e8] sm:$0xf]  ;;  %v4933_v35 = vld [vmem:[%s5423_s24 + $0x2b4] sm:$0xf0] }
 0x131   : > { %2901 = vmatpush.bf16.msrb.mxu2 %v4578_v47  ;;  %v1129_v9 = vpop.f32.mrf.mxu0  ;;  %2893 = vmatpush.bf16.msrb.mxu1 %v4370_v5  ;;  %v3765_v47 = vld [vmem:[%s5423_s24 + $0x68] sm:$0xf]  ;;  %v4973_v38 = vld [vmem:[%s5423_s24 + $0x3f4] sm:$0xf0]  ;;  %v4342_v44 = vor.u32 %v5005_v28, %v4341_v27 }
 0x132   : > { %2817 = vmatmul.bf16.vlgmr.msrb.gmra.mxu0 %v5722_v4  ;;  %2882 = vmatmul.bf16.vlgmr.msrb.gmra.mxu3 %v5668_v37  ;;  %v3766_v55 = vor.u32 %v4861_v48, %v3765_v47  ;;  %v4085_v5 = vld [vmem:[%s5423_s24 + $0x2e8] sm:$0xf]  ;;  %v4893_v9 = vld [vmem:[%s5423_s24 + $0x174] sm:$0xf0] }
 0x133   : > { %2926 = vmatpush.bf16.msra.mxu3 %v3830_v62  ;;  %2913 = vmatpush.bf16.msrb.mxu0 %v4722_v0  ;;  %v3749_v62 = vld [vmem:[%s5423_s24 + $0x48] sm:$0xf]  ;;  %v5038_v0 = vld [vmem:[%s5423_s24 + $0x604] sm:$0xf]  ;;  %v4086_v14 = vor.u32 %v4941_v6, %v4085_v5  ;;  %v3894_v17 = vor.u32 %v4893_v9, %v3893_v8  ;;  %v4885_v43 = vld [vmem:[%s5423_s24 + $0x134] sm:$0xf0] }
 0x134   : > { %v4482_v10 = vor.u32 %v5038_v0, %v4479_v1  ;;  %v4053_v33 = vld [vmem:[%s5423_s24 + $0x2a8] sm:$0xf]  ;;  %v4929_v53 = vld [vmem:[%s5423_s24 + $0x294] sm:$0xf0] }
 0x135   : > { %2902 = vmatpush.bf16.msrb.mxu2 %v4562_v63  ;;  %2894 = vmatpush.bf16.msrb.mxu1 %v4354_v20  ;;  %v4857_v63 = vld [vmem:[%s5423_s24 + $0x54] sm:$0xf0]  ;;  %v4213_v36 = vld [vmem:[%s5423_s24 + $0x3e8] sm:$0xf] }
 0x136   : > { %v3750_v7 = vor.u32 %v4857_v63, %v3749_v62  ;;  %v4214_v47 = vor.u32 %v4973_v38, %v4213_v36  ;;  %v4325_v48 = vld [vmem:[%s5423_s24 + $0x4c8] sm:$0xf]  ;;  %v4881_v58 = vld [vmem:[%s5423_s24 + $0x114] sm:$0xf0]  ;;  %v4038_v63 = vor.u32 %v4929_v53, %v4037_v51 }
 0x137   : > { %2927 = vmatpush.bf16.msra.mxu3 %v3814_v12  ;;  %2914 = vmatpush.bf16.msrb.mxu0 %v4706_v16  ;;  %v3733_v12 = vld [vmem:[%s5423_s24 + $0x28] sm:$0xf]  ;;  %v4623_v16 = vld [vmem:[%s5423_s24 + $0x730] sm:$0xf0]  ;;  %v5037_v62 = vld [vmem:[%s5423_s24 + $0x5f4] sm:$0xf0] }
 0x138   : > { %2895 = vmatmul.bf16.vlgmr.msrb.gmra.mxu1 %v5679_v60  ;;  %v3734_v20 = vor.u32 %v4853_v56, %v3733_v12  ;;  %v3845_v57 = vld [vmem:[%s5423_s24 + $0x108] sm:$0xf]  ;;  %v4925_v5 = vld [vmem:[%s5423_s24 + $0x274] sm:$0xf0] }
 0x139   : > { %2903 = vmatpush.bf16.msrb.mxu2 %v4546_v15  ;;  %2939 = vmatpush.bf16.msra.mxu1 %v3958_v25  ;;  %v5074_v15 = vld [vmem:[%s5423_s24 + $0x724] sm:$0xf]  ;;  %v4309_v1 = vld [vmem:[%s5423_s24 + $0x4a8] sm:$0xf]  ;;  %v3846_v3 = vor.u32 %v4881_v58, %v3845_v57  ;;  %v4965_v8 = vld [vmem:[%s5423_s24 + $0x3b4] sm:$0xf0] }
 0x13a   : > { %v4626_v25 = vor.u32 %v5074_v15, %v4623_v16  ;;  %v4310_v9 = vor.u32 %v4997_v2, %v4309_v1  ;;  %v4293_v56 = vld [vmem:[%s5423_s24 + $0x488] sm:$0xf]  ;;  %v5029_v24 = vld [vmem:[%s5423_s24 + $0x5b4] sm:$0xf0] }
 0x13b   : > { %2928 = vmatpush.bf16.msra.mxu3 %v3798_v26  ;;  %2915 = vmatpush.bf16.msrb.mxu0 %v4690_v31  ;;  %v4849_v26 = vld [vmem:[%s5423_s24 + $0x14] sm:$0xf0]  ;;  %v5070_v31 = vld [vmem:[%s5423_s24 + $0x704] sm:$0xf]  ;;  %v4005_v16 = vld [vmem:[%s5423_s24 + $0x248] sm:$0xf] }
 0x13c   : > { %2856 = vmatmul.bf16.vlgmr.msra.gmra.mxu2 %v5624_v22  ;;  %v4437_v23 = vld [vmem:[%s5423_s24 + $0x5a8] sm:$0xf]  ;;  %v4989_v27 = vld [vmem:[%s5423_s24 + $0x474] sm:$0xf0] }
 0x13d   : > { %2904 = vmatpush.bf16.msrb.mxu2 %v4530_v30  ;;  %2940 = vmatpush.bf16.msra.mxu1 %v3942_v39  ;;  %v4070_v30 = vor.u32 %v4937_v19, %v4069_v18  ;;  %v3718_v39 = vor.u32 %v4849_v26, %v3717_v21  ;;  %v4165_v19 = vld [vmem:[%s5423_s24 + $0x388] sm:$0xf]  ;;  %v5025_v38 = vld [vmem:[%s5423_s24 + $0x594] sm:$0xf0] }
 0x13e   : > { %v4277_v26 = vld [vmem:[%s5423_s24 + $0x468] sm:$0xf]  ;;  %v4949_v1 = vld [vmem:[%s5423_s24 + $0x334] sm:$0xf0] }
 0x13f   : > { %2929 = vmatpush.bf16.msra.mxu3 %v3782_v42  ;;  %2916 = vmatpush.bf16.msrb.mxu0 %v4674_v46  ;;  %v3861_v42 = vld [vmem:[%s5423_s24 + $0x128] sm:$0xf]  ;;  %v4054_v46 = vor.u32 %v4933_v35, %v4053_v33  ;;  %v4278_v35 = vor.u32 %v4989_v27, %v4277_v26  ;;  %v5013_v26 = vld [vmem:[%s5423_s24 + $0x534] sm:$0xf0] }
 0x140   : > { %v3862_v52 = vor.u32 %v4885_v43, %v3861_v42  ;;  %v4149_v33 = vld [vmem:[%s5423_s24 + $0x368] sm:$0xf]  ;;  %v4985_v43 = vld [vmem:[%s5423_s24 + $0x454] sm:$0xf0] }
 0x141   : > { %2905 = vmatpush.bf16.msrb.mxu2 %v4514_v45  ;;  %2941 = vmatpush.bf16.msra.mxu1 %v3926_v54  ;;  %v4610_v45 = vor.u32 %v5070_v31, %v4607_v32  ;;  %v4197_v54 = vld [vmem:[%s5423_s24 + $0x3c8] sm:$0xf]  ;;  %v4917_v31 = vld [vmem:[%s5423_s24 + $0x234] sm:$0xf0]  ;;  %v4438_v32 = vor.u32 %v5029_v24, %v4437_v23 }
 0x142   : > { %2869 = vmatmul.bf16.vlgmr.msra.gmra.mxu0 %v5639_v50  ;;  %v4421_v36 = vld [vmem:[%s5423_s24 + $0x588] sm:$0xf]  ;;  %v5101_v23 = vld [vmem:[%s5423_s24 + $0x7f4] sm:$0xf0] }
 0x143   : > { %2930 = vmatpush.bf16.msra.mxu3 %v3766_v55  ;;  %2917 = vmatpush.bf16.msrb.mxu0 %v4658_v61  ;;  %v4969_v55 = vld [vmem:[%s5423_s24 + $0x3d4] sm:$0xf0]  ;;  %v4469_v61 = vld [vmem:[%s5423_s24 + $0x5e8] sm:$0xf] }
 0x144   : > { %v4198_v0 = vor.u32 %v4969_v55, %v4197_v54  ;;  %v4470_v6 = vor.u32 %v5037_v62, %v4469_v61  ;;  %v4261_v42 = vld [vmem:[%s5423_s24 + $0x448] sm:$0xf]  ;;  %v5021_v55 = vld [vmem:[%s5423_s24 + $0x574] sm:$0xf0] }
 0x145   : > { %2906 = vmatpush.bf16.msrb.mxu2 %v4498_v59  ;;  %2942 = vmatpush.bf16.msra.mxu1 %v3910_v41  ;;  %v4326_v59 = vor.u32 %v5001_v49, %v4325_v48  ;;  %v4021_v41 = vld [vmem:[%s5423_s24 + $0x268] sm:$0xf]  ;;  %v4422_v48 = vor.u32 %v5025_v38, %v4421_v36  ;;  %v4953_v49 = vld [vmem:[%s5423_s24 + $0x354] sm:$0xf0]  ;;  %v4262_v53 = vor.u32 %v4985_v43, %v4261_v42 }
 0x146   : > { %v4022_v12 = vor.u32 %v4925_v5, %v4021_v41  ;;  %v4597_v51 = vld [vmem:[%s5423_s24 + $0x6e8] sm:$0xf]  ;;  %v5097_v38 = vld [vmem:[%s5423_s24 + $0x7d4] sm:$0xf0] }
 0x147   : > { %2931 = vmatpush.bf16.msra.mxu3 %v3750_v7  ;;  %2918 = vmatpush.bf16.msrb.mxu0 %v4642_v11  ;;  %v4181_v7 = vld [vmem:[%s5423_s24 + $0x3a8] sm:$0xf]  ;;  %v5033_v11 = vld [vmem:[%s5423_s24 + $0x5d4] sm:$0xf0] }
 0x148   : > { %v4182_v15 = vor.u32 %v4965_v8, %v4181_v7  ;;  %v4405_v54 = vld [vmem:[%s5423_s24 + $0x568] sm:$0xf]  ;;  %v4977_v8 = vld [vmem:[%s5423_s24 + $0x414] sm:$0xf0] }
 0x149   : > { %2907 = vmatpush.bf16.msrb.mxu2 %v4482_v10  ;;  %2943 = vmatpush.bf16.msra.mxu1 %v3894_v17  ;;  %v4453_v10 = vld [vmem:[%s5423_s24 + $0x5c8] sm:$0xf]  ;;  %v4921_v17 = vld [vmem:[%s5423_s24 + $0x254] sm:$0xf0] }
 0x14a   : > { %v4454_v18 = vor.u32 %v5033_v11, %v4453_v10  ;;  %v4245_v58 = vld [vmem:[%s5423_s24 + $0x428] sm:$0xf]  ;;  %v4875_v11 = vld [vmem:[%s5423_s24 + $0xec] sm:$0xf]  ;;  %v5009_v43 = vld [vmem:[%s5423_s24 + $0x514] sm:$0xf0] }
 0x14b   : > { %2932 = vmatpush.bf16.msra.mxu3 %v3734_v20  ;;  %2919 = vmatpush.bf16.msrb.mxu0 %v4626_v25  ;;  %v4961_v20 = vld [vmem:[%s5423_s24 + $0x394] sm:$0xf0]  ;;  %v4006_v25 = vor.u32 %v4921_v17, %v4005_v16  ;;  %v4581_v2 = vld [vmem:[%s5423_s24 + $0x6c8] sm:$0xf] }
 0x14c   : > { %2908 = vmatmul.bf16.vlgmr.msrb.gmra.mxu2 %v5701_v29  ;;  %v4166_v28 = vor.u32 %v4961_v20, %v4165_v19  ;;  %v4389_v5 = vld [vmem:[%s5423_s24 + $0x548] sm:$0xf]  ;;  %v4945_v16 = vld [vmem:[%s5423_s24 + $0x314] sm:$0xf0] }
 0x14d   : > { %2952 = vmatpush.bf16.msra.mxu2 %v4086_v14  ;;  %2944 = vmatpush.bf16.msra.mxu1 %v3878_v34  ;;  %v4993_v14 = vld [vmem:[%s5423_s24 + $0x494] sm:$0xf0]  ;;  %v4229_v7 = vld [vmem:[%s5423_s24 + $0x408] sm:$0xf] }
 0x14e   : > { %v4294_v21 = vor.u32 %v4993_v14, %v4293_v56  ;;  %v4957_v34 = vld [vmem:[%s5423_s24 + $0x374] sm:$0xf0]  ;;  %v4101_v56 = vld [vmem:[%s5423_s24 + $0x308] sm:$0xf]  ;;  %v4230_v20 = vor.u32 %v4977_v8, %v4229_v7 }
 0x14f   : > { %2933 = vmatpush.bf16.msra.mxu3 %v3718_v39  ;;  %2920 = vmatpush.bf16.msrb.mxu0 %v4610_v45  ;;  %v3973_v45 = vld [vmem:[%s5423_s24 + $0x208] sm:$0xf]  ;;  %v4102_v27 = vor.u32 %v4945_v16, %v4101_v56  ;;  %v5089_v7 = vld [vmem:[%s5423_s24 + $0x794] sm:$0xf0]  ;;  %v4899_v56 = vld [vmem:[%s5423_s24 + $0x1ac] sm:$0xf] }
 0x150   : > { %v4565_v17 = vld [vmem:[%s5423_s24 + $0x6a8] sm:$0xf] }
 0x151   : > { %2953 = vmatpush.bf16.msra.mxu2 %v4070_v30  ;;  %2945 = vmatpush.bf16.msra.mxu1 %v3862_v52  ;;  %v3989_v30 = vld [vmem:[%s5423_s24 + $0x228] sm:$0xf]  ;;  %v5069_v52 = vld [vmem:[%s5423_s24 + $0x6f4] sm:$0xf0] }
 0x152   : > { %2934 = vmatmul.bf16.vlgmr.msra.gmra.mxu3 %v5578_v13  ;;  %2921 = vmatmul.bf16.vlgmr.msrb.gmra.mxu0 %v5722_v4  ;;  %v3990_v39 = vor.u32 %v4917_v31, %v3989_v30  ;;  %v4598_v62 = vor.u32 %v5069_v52, %v4597_v51  ;;  %v4871_v30 = vld [vmem:[%s5423_s24 + $0xcc] sm:$0xf]  ;;  %v3815_v31 = vld [vmem:[%s5423_s24 + $0xd8] sm:$0xf0]  ;;  %v4709_v36 = vld [vmem:[%s5423_s24 + $0x7c8] sm:$0xf] }
 0x153   : > { %2978 = vmatpush.bf16.msrb.mxu3 %v4342_v44  ;;  %2965 = vmatpush.bf16.msra.mxu0 %v4214_v47  ;;  %v4150_v44 = vor.u32 %v4957_v34, %v4149_v33  ;;  %v4133_v47 = vld [vmem:[%s5423_s24 + $0x348] sm:$0xf]  ;;  %v5057_v34 = vld [vmem:[%s5423_s24 + $0x694] sm:$0xf0]  ;;  %v4710_v51 = vor.u32 %v5097_v38, %v4709_v36  ;;  %v4939_v38 = vld [vmem:[%s5423_s24 + $0x2ec] sm:$0xf] }
 0x154   : > { %v4134_v61 = vor.u32 %v4953_v49, %v4133_v47  ;;  %v4549_v33 = vld [vmem:[%s5423_s24 + $0x688] sm:$0xf]  ;;  %v4907_v47 = vld [vmem:[%s5423_s24 + $0x1ec] sm:$0xf]  ;;  %v5081_v36 = vld [vmem:[%s5423_s24 + $0x754] sm:$0xf0] }
 0x155   : > { %2954 = vmatpush.bf16.msra.mxu2 %v4054_v46  ;;  %2946 = vmatpush.bf16.msra.mxu1 %v3846_v3  ;;  %v4913_v46 = vld [vmem:[%s5423_s24 + $0x214] sm:$0xf0]  ;;  %v4357_v42 = vld [vmem:[%s5423_s24 + $0x508] sm:$0xf] }
 0x156   : > { %v3974_v57 = vor.u32 %v4913_v46, %v3973_v45  ;;  %v5065_v3 = vld [vmem:[%s5423_s24 + $0x6d4] sm:$0xf0]  ;;  %v4550_v45 = vor.u32 %v5057_v34, %v4549_v33  ;;  %v3799_v46 = vld [vmem:[%s5423_s24 + $0xb8] sm:$0xf0]  ;;  %v4533_v52 = vld [vmem:[%s5423_s24 + $0x668] sm:$0xf] }
 0x157   : > { %2979 = vmatpush.bf16.msrb.mxu3 %v4326_v59  ;;  %2966 = vmatpush.bf16.msra.mxu0 %v4198_v0  ;;  %v4981_v59 = vld [vmem:[%s5423_s24 + $0x434] sm:$0xf0]  ;;  %v4406_v0 = vor.u32 %v5021_v55, %v4405_v54  ;;  %v4582_v10 = vor.u32 %v5065_v3, %v4581_v2  ;;  %v4358_v55 = vor.u32 %v5009_v43, %v4357_v42  ;;  %v3943_v2 = vld [vmem:[%s5423_s24 + $0x1d8] sm:$0xf0]  ;;  %v4645_v34 = vld [vmem:[%s5423_s24 + $0x748] sm:$0xf] }
 0x158   : > { %2947 = vmatmul.bf16.vlgmr.msra.gmra.mxu1 %v5595_v40  ;;  %v4246_v41 = vor.u32 %v4981_v59, %v4245_v58  ;;  %v5093_v58 = vld [vmem:[%s5423_s24 + $0x7b4] sm:$0xf0] }
 0x159   : > { %2955 = vmatpush.bf16.msra.mxu2 %v4038_v63  ;;  %2991 = vmatpush.bf16.msrb.mxu1 %v4470_v6  ;;  %v4117_v63 = vld [vmem:[%s5423_s24 + $0x328] sm:$0xf]  ;;  %v5017_v6 = vld [vmem:[%s5423_s24 + $0x554] sm:$0xf0] }
 0x15a   : > { %v5041_v33 = vld [vmem:[%s5423_s24 + $0x614] sm:$0xf0] }
 0x15b   : > { %2980 = vmatpush.bf16.msrb.mxu3 %v4310_v9  ;;  %2967 = vmatpush.bf16.msra.mxu0 %v4182_v15  ;;  %v4118_v9 = vor.u32 %v4949_v1, %v4117_v63  ;;  %v4390_v15 = vor.u32 %v5017_v6, %v4389_v5  ;;  %v4903_v1 = vld [vmem:[%s5423_s24 + $0x1cc] sm:$0xf]  ;;  %v5049_v5 = vld [vmem:[%s5423_s24 + $0x654] sm:$0xf0]  ;;  %v4677_v6 = vld [vmem:[%s5423_s24 + $0x788] sm:$0xf] }
 0x15c   : > { %v4678_v16 = vor.u32 %v5089_v7, %v4677_v6  ;;  %v5073_v6 = vld [vmem:[%s5423_s24 + $0x714] sm:$0xf0]  ;;  %v4931_v7 = vld [vmem:[%s5423_s24 + $0x2ac] sm:$0xf] }
 0x15d   : > { %2956 = vmatpush.bf16.msra.mxu2 %v4022_v12  ;;  %2992 = vmatpush.bf16.msrb.mxu1 %v4454_v18  ;;  %v3831_v12 = vld [vmem:[%s5423_s24 + $0xf8] sm:$0xf0]  ;;  %v5851_v14 = vpop.f32.mrf.mxu3  ;;  %v5061_v18 = vld [vmem:[%s5423_s24 + $0x6b4] sm:$0xf0]  ;;  %v5856_v19 = vpop.f32.mrf.mxu1 }
 0x15e   : > { %v3834_v24 = vor.u32 %v4875_v11, %v3831_v12  ;;  %v3767_v12 = vld [vmem:[%s5423_s24 + $0x78] sm:$0xf0] }
 0x15f   : > { %2981 = vmatpush.bf16.msrb.mxu3 %v4294_v21  ;;  %2968 = vmatpush.bf16.msra.mxu0 %v4166_v28  ;;  %v4725_v21 = vld [vmem:[%s5423_s24 + $0x7e8] sm:$0xf]  ;;  %v4566_v28 = vor.u32 %v5061_v18, %v4565_v17  ;;  %v5045_v18 = vld [vmem:[%s5423_s24 + $0x634] sm:$0xf0] }
 0x160   : > { %v4501_v17 = vld [vmem:[%s5423_s24 + $0x628] sm:$0xf] }
 0x161   : > { %2957 = vmatpush.bf16.msra.mxu2 %v4006_v25  ;;  %2993 = vmatpush.bf16.msrb.mxu1 %v4438_v32  ;;  %v4373_v25 = vld [vmem:[%s5423_s24 + $0x528] sm:$0xf]  ;;  %v4726_v32 = vor.u32 %v5101_v23, %v4725_v21  ;;  %v5085_v21 = vld [vmem:[%s5423_s24 + $0x774] sm:$0xf0] }
 0x163   : > { %2982 = vmatpush.bf16.msrb.mxu3 %v4278_v35  ;;  %2969 = vmatpush.bf16.msra.mxu0 %v4150_v44  ;;  %v4374_v35 = vor.u32 %v5013_v26, %v4373_v25  ;;  %v4867_v44 = vld [vmem:[%s5423_s24 + $0xac] sm:$0xf]  ;;  %v4502_v26 = vor.u32 %v5045_v18, %v4501_v17  ;;  %v3863_v18 = vld [vmem:[%s5423_s24 + $0x138] sm:$0xf0] }
 0x164   : > { %v3802_v59 = vor.u32 %v4867_v44, %v3799_v46  ;;  %v4855_v25 = vld [vmem:[%s5423_s24 + $0x4c] sm:$0xf] }
 0x165   : > { %2958 = vmatpush.bf16.msra.mxu2 %v3990_v39  ;;  %2994 = vmatpush.bf16.msrb.mxu1 %v4422_v48  ;;  %v3818_v39 = vor.u32 %v4871_v30, %v3815_v31  ;;  %v3959_v48 = vld [vmem:[%s5423_s24 + $0x1f8] sm:$0xf0]  ;;  %v2729_v49 = vpop.f32.mrf.mxu3  ;;  %v2742_v54 = vpop.f32.mrf.mxu1  ;;  %v4883_v17 = vld [vmem:[%s5423_s24 + $0x12c] sm:$0xf] }
 0x166   : > { %v3911_v30 = vld [vmem:[%s5423_s24 + $0x198] sm:$0xf0]  ;;  %v5077_v54 = vld [vmem:[%s5423_s24 + $0x734] sm:$0xf0] }
 0x167   : > { %2983 = vmatpush.bf16.msrb.mxu3 %v4262_v53  ;;  %2970 = vmatpush.bf16.msra.mxu0 %v4134_v61  ;;  %v5053_v53 = vld [vmem:[%s5423_s24 + $0x674] sm:$0xf0]  ;;  %v3962_v61 = vor.u32 %v4907_v47, %v3959_v48  ;;  %v3735_v47 = vld [vmem:[%s5423_s24 + $0x38] sm:$0xf0]  ;;  %v4891_v48 = vld [vmem:[%s5423_s24 + $0x16c] sm:$0xf] }
 0x168   : > { %v4534_v63 = vor.u32 %v5053_v53, %v4533_v52  ;;  %v3895_v49 = vld [vmem:[%s5423_s24 + $0x178] sm:$0xf0]  ;;  %v4629_v53 = vld [vmem:[%s5423_s24 + $0x728] sm:$0xf] }
 0x169   : > { %2959 = vmatpush.bf16.msra.mxu2 %v3974_v57  ;;  %2995 = vmatpush.bf16.msrb.mxu1 %v4406_v0  ;;  %v4693_v57 = vld [vmem:[%s5423_s24 + $0x7a8] sm:$0xf]  ;;  %v3783_v0 = vld [vmem:[%s5423_s24 + $0x98] sm:$0xf0] }
 0x16a   : > { %v4694_v3 = vor.u32 %v5093_v58, %v4693_v57  ;;  %v4071_v57 = vld [vmem:[%s5423_s24 + $0x2d8] sm:$0xf0] }
 0x16b   : > { %2984 = vmatpush.bf16.msrb.mxu3 %v4246_v41  ;;  %2971 = vmatpush.bf16.msra.mxu0 %v4118_v9  ;;  %v4517_v41 = vld [vmem:[%s5423_s24 + $0x648] sm:$0xf]  ;;  %v3946_v9 = vor.u32 %v4903_v1, %v3943_v2  ;;  %v4630_v1 = vor.u32 %v5077_v54, %v4629_v53  ;;  %v4991_v53 = vld [vmem:[%s5423_s24 + $0x48c] sm:$0xf] }
 0x16c   : > { %2960 = vmatmul.bf16.vlgmr.msra.gmra.mxu2 %v5624_v22  ;;  %v4518_v11 = vor.u32 %v5049_v5, %v4517_v41  ;;  %v4343_v41 = vld [vmem:[%s5423_s24 + $0x4f8] sm:$0xf0]  ;;  %v4613_v5 = vld [vmem:[%s5423_s24 + $0x708] sm:$0xf] }
 0x16d   : > { %3004 = vmatpush.bf16.msrb.mxu2 %v4598_v62  ;;  %2996 = vmatpush.bf16.msrb.mxu1 %v4390_v15  ;;  %v4863_v62 = vld [vmem:[%s5423_s24 + $0x8c] sm:$0xf]  ;;  %v3927_v15 = vld [vmem:[%s5423_s24 + $0x1b8] sm:$0xf0] }
 0x16e   : > { %v3786_v8 = vor.u32 %v4863_v62, %v3783_v0  ;;  %v3719_v62 = vld [vmem:[%s5423_s24 + $0x18] sm:$0xf0] }
 0x16f   : > { %2985 = vmatpush.bf16.msrb.mxu3 %v4230_v20  ;;  %2972 = vmatpush.bf16.msra.mxu0 %v4102_v27  ;;  %v4661_v20 = vld [vmem:[%s5423_s24 + $0x768] sm:$0xf]  ;;  %v3751_v27 = vld [vmem:[%s5423_s24 + $0x58] sm:$0xf0] }
 0x170   : > { %v4662_v31 = vor.u32 %v5085_v21, %v4661_v20  ;;  %v3754_v43 = vor.u32 %v4855_v25, %v3751_v27  ;;  %v3879_v0 = vld [vmem:[%s5423_s24 + $0x158] sm:$0xf0]  ;;  %v4614_v20 = vor.u32 %v5073_v6, %v4613_v5 }
 0x171   : > { %3005 = vmatpush.bf16.msrb.mxu2 %v4582_v10  ;;  %2997 = vmatpush.bf16.msrb.mxu1 %v4374_v35  ;;  %v4859_v10 = vld [vmem:[%s5423_s24 + $0x6c] sm:$0xf]  ;;  %v4039_v27 = vld [vmem:[%s5423_s24 + $0x298] sm:$0xf0] }
 0x172   : > { %2986 = vmatmul.bf16.vlgmr.msrb.gmra.mxu3 %v5668_v37  ;;  %2973 = vmatmul.bf16.vlgmr.msra.gmra.mxu0 %v5639_v50  ;;  %v3770_v23 = vor.u32 %v4859_v10, %v3767_v12  ;;  %v4971_v12 = vld [vmem:[%s5423_s24 + $0x3ec] sm:$0xf]  ;;  %v4279_v6 = vld [vmem:[%s5423_s24 + $0x478] sm:$0xf0] }
 0x173   : > { %3030 = vmatpush.bf16.msra.mxu3 %v3834_v24  ;;  %3017 = vmatpush.bf16.msrb.mxu0 %v4726_v32  ;;  %v3930_v24 = vor.u32 %v4899_v56, %v3927_v15  ;;  %v4485_v32 = vld [vmem:[%s5423_s24 + $0x608] sm:$0xf]  ;;  %v4215_v56 = vld [vmem:[%s5423_s24 + $0x3f8] sm:$0xf0] }
 0x174   : > { %v4486_v46 = vor.u32 %v5041_v33, %v4485_v32  ;;  %v4218_v25 = vor.u32 %v4971_v12, %v4215_v56  ;;  %v4879_v33 = vld [vmem:[%s5423_s24 + $0x10c] sm:$0xf]  ;;  %v4151_v56 = vld [vmem:[%s5423_s24 + $0x378] sm:$0xf0] }
 0x175   : > { %3006 = vmatpush.bf16.msrb.mxu2 %v4566_v28  ;;  %2998 = vmatpush.bf16.msrb.mxu1 %v4358_v55  ;;  %v4895_v28 = vld [vmem:[%s5423_s24 + $0x18c] sm:$0xf] }
 0x176   : > { %v3914_v44 = vor.u32 %v4895_v28, %v3911_v30  ;;  %v4935_v55 = vld [vmem:[%s5423_s24 + $0x2cc] sm:$0xf]  ;;  %v3866_v28 = vor.u32 %v4883_v17, %v3863_v18 }
 0x177   : > { %3031 = vmatpush.bf16.msra.mxu3 %v3818_v39  ;;  %3018 = vmatpush.bf16.msrb.mxu0 %v4710_v51  ;;  %v5905_v35 = vpop.f32.mrf.mxu2  ;;  %v4087_v39 = vld [vmem:[%s5423_s24 + $0x2f8] sm:$0xf0]  ;;  %v5910_v42 = vpop.f32.mrf.mxu0  ;;  %v4646_v51 = vor.u32 %v5081_v36, %v4645_v34  ;;  %v4074_v2 = vor.u32 %v4935_v55, %v4071_v57  ;;  %v4967_v30 = vld [vmem:[%s5423_s24 + $0x3cc] sm:$0xf] }
 0x178   : > { %2999 = vmatmul.bf16.vlgmr.msrb.gmra.mxu1 %v5679_v60  ;;  %v4090_v52 = vor.u32 %v4939_v38, %v4087_v39  ;;  %v3847_v34 = vld [vmem:[%s5423_s24 + $0x118] sm:$0xf0]  ;;  %v4995_v36 = vld [vmem:[%s5423_s24 + $0x4ac] sm:$0xf] }
 0x179   : > { %3007 = vmatpush.bf16.msrb.mxu2 %v4550_v45  ;;  %3043 = vmatpush.bf16.msra.mxu1 %v3962_v61  ;;  %v4851_v45 = vld [vmem:[%s5423_s24 + $0x2c] sm:$0xf]  ;;  %v4311_v39 = vld [vmem:[%s5423_s24 + $0x4b8] sm:$0xf0] }
 0x17a   : > { %v3738_v58 = vor.u32 %v4851_v45, %v3735_v47  ;;  %v4847_v61 = vld [vmem:[%s5423_s24 + $0xc] sm:$0xf]  ;;  %v4023_v47 = vld [vmem:[%s5423_s24 + $0x278] sm:$0xf0] }
 0x17b   : > { %3032 = vmatpush.bf16.msra.mxu3 %v3802_v59  ;;  %3019 = vmatpush.bf16.msrb.mxu0 %v4694_v3  ;;  %v3898_v59 = vor.u32 %v4891_v48, %v3895_v49  ;;  %v5003_v3 = vld [vmem:[%s5423_s24 + $0x4ec] sm:$0xf]  ;;  %v3722_v10 = vor.u32 %v4847_v61, %v3719_v62  ;;  %v3850_v48 = vor.u32 %v4879_v33, %v3847_v34  ;;  %v4295_v55 = vld [vmem:[%s5423_s24 + $0x498] sm:$0xf0] }
 0x17c   : > { %v4963_v49 = vld [vmem:[%s5423_s24 + $0x3ac] sm:$0xf]  ;;  %v4007_v62 = vld [vmem:[%s5423_s24 + $0x258] sm:$0xf0] }
 0x17d   : > { %3008 = vmatpush.bf16.msrb.mxu2 %v4534_v63  ;;  %3044 = vmatpush.bf16.msra.mxu1 %v3946_v9  ;;  %v4887_v63 = vld [vmem:[%s5423_s24 + $0x14c] sm:$0xf]  ;;  %v4599_v33 = vld [vmem:[%s5423_s24 + $0x6f8] sm:$0xf0] }
 0x17e   : > { %v5031_v57 = vld [vmem:[%s5423_s24 + $0x5cc] sm:$0xf] }
 0x17f   : > { %3033 = vmatpush.bf16.msra.mxu3 %v3786_v8  ;;  %3020 = vmatpush.bf16.msrb.mxu0 %v4678_v16  ;;  %v4055_v8 = vld [vmem:[%s5423_s24 + $0x2b8] sm:$0xf0]  ;;  %v2755_v9 = vpop.f32.mrf.mxu2  ;;  %v2768_v15 = vpop.f32.mrf.mxu0  ;;  %v4346_v16 = vor.u32 %v5003_v3, %v4343_v41  ;;  %v4919_v61 = vld [vmem:[%s5423_s24 + $0x24c] sm:$0xf] }
 0x180   : > { %v4058_v21 = vor.u32 %v4931_v7, %v4055_v8  ;;  %v4987_v41 = vld [vmem:[%s5423_s24 + $0x46c] sm:$0xf]  ;;  %v4010_v5 = vor.u32 %v4919_v61, %v4007_v62  ;;  %v4439_v8 = vld [vmem:[%s5423_s24 + $0x5b8] sm:$0xf0] }
 0x181   : > { %3009 = vmatpush.bf16.msrb.mxu2 %v4518_v11  ;;  %3045 = vmatpush.bf16.msra.mxu1 %v3930_v24  ;;  %v3882_v11 = vor.u32 %v4887_v63, %v3879_v0  ;;  %v4327_v24 = vld [vmem:[%s5423_s24 + $0x4d8] sm:$0xf0]  ;;  %v4959_v63 = vld [vmem:[%s5423_s24 + $0x38c] sm:$0xf] }
 0x182   : > { %v4167_v0 = vld [vmem:[%s5423_s24 + $0x398] sm:$0xf0]  ;;  %v5027_v7 = vld [vmem:[%s5423_s24 + $0x5ac] sm:$0xf] }
 0x183   : > { %3034 = vmatpush.bf16.msra.mxu3 %v3770_v23  ;;  %3021 = vmatpush.bf16.msrb.mxu0 %v4662_v31  ;;  %v4999_v23 = vld [vmem:[%s5423_s24 + $0x4cc] sm:$0xf]  ;;  %v4199_v31 = vld [vmem:[%s5423_s24 + $0x3d8] sm:$0xf0]  ;;  %v4170_v9 = vor.u32 %v4959_v63, %v4167_v0  ;;  %v4442_v17 = vor.u32 %v5027_v7, %v4439_v8 }
 0x184   : > { %v4330_v32 = vor.u32 %v4999_v23, %v4327_v24  ;;  %v4202_v45 = vor.u32 %v4967_v30, %v4199_v31  ;;  %v4955_v12 = vld [vmem:[%s5423_s24 + $0x36c] sm:$0xf]  ;;  %v4423_v23 = vld [vmem:[%s5423_s24 + $0x598] sm:$0xf0] }
 0x185   : > { %3010 = vmatpush.bf16.msrb.mxu2 %v4502_v26  ;;  %3046 = vmatpush.bf16.msra.mxu1 %v3914_v44  ;;  %v4927_v26 = vld [vmem:[%s5423_s24 + $0x28c] sm:$0xf]  ;;  %v4471_v44 = vld [vmem:[%s5423_s24 + $0x5f8] sm:$0xf0] }
 0x186   : > { %v4042_v38 = vor.u32 %v4927_v26, %v4039_v27  ;;  %v4911_v26 = vld [vmem:[%s5423_s24 + $0x20c] sm:$0xf]  ;;  %v3975_v27 = vld [vmem:[%s5423_s24 + $0x218] sm:$0xf0] }
 0x187   : > { %3035 = vmatpush.bf16.msra.mxu3 %v3754_v43  ;;  %3022 = vmatpush.bf16.msrb.mxu0 %v4646_v51  ;;  %v5035_v43 = vld [vmem:[%s5423_s24 + $0x5ec] sm:$0xf]  ;;  %v4183_v51 = vld [vmem:[%s5423_s24 + $0x3b8] sm:$0xf0] }
 0x188   : > { %v4135_v31 = vld [vmem:[%s5423_s24 + $0x358] sm:$0xf0]  ;;  %v4943_v63 = vld [vmem:[%s5423_s24 + $0x30c] sm:$0xf] }
 0x189   : > { %3011 = vmatpush.bf16.msrb.mxu2 %v4486_v46  ;;  %3047 = vmatpush.bf16.msra.mxu1 %v3898_v59  ;;  %v4923_v46 = vld [vmem:[%s5423_s24 + $0x26c] sm:$0xf]  ;;  %v4186_v59 = vor.u32 %v4963_v49, %v4183_v51  ;;  %v4119_v51 = vld [vmem:[%s5423_s24 + $0x338] sm:$0xf0] }
 0x18a   : > { %v4026_v54 = vor.u32 %v4923_v46, %v4023_v47  ;;  %v5099_v8 = vld [vmem:[%s5423_s24 + $0x7ec] sm:$0xf] }
 0x18b   : > { %3036 = vmatpush.bf16.msra.mxu3 %v3738_v58  ;;  %3023 = vmatpush.bf16.msrb.mxu0 %v4630_v1  ;;  %v4455_v58 = vld [vmem:[%s5423_s24 + $0x5d8] sm:$0xf0]  ;;  %v5965_v1 = vld [vmem:[%s1171_s6] sm:$0xf] }
 0x18c   : > { %3012 = vmatmul.bf16.vlgmr.msrb.gmra.mxu2 %v5701_v29  ;;  %v4458_v3 = vor.u32 %v5031_v57, %v4455_v58  ;;  %v1430_v15 = vperm.slane %v5965_v1, 0  ;;  %v4231_v57 = vld [vmem:[%s5423_s24 + $0x418] sm:$0xf0]  ;;  %v5015_v58 = vld [vmem:[%s5423_s24 + $0x54c] sm:$0xf] }
 0x18d   : > { %3056 = vmatpush.bf16.msra.mxu2 %v4090_v52  ;;  %3048 = vmatpush.bf16.msra.mxu1 %v3882_v11  ;;  %v4474_v52 = vor.u32 %v5035_v43, %v4471_v44  ;;  %v3991_v11 = vld [vmem:[%s5423_s24 + $0x238] sm:$0xf0]  ;;  %v5019_v44 = vld [vmem:[%s5423_s24 + $0x56c] sm:$0xf] }
 0x18e   : > { %v4247_v43 = vld [vmem:[%s5423_s24 + $0x438] sm:$0xf0]  ;;  %v2728_v49 = vadd.f32 %v5851_v14, %v1430_v15 }
 0x18f   : > { %3037 = vmatpush.bf16.msra.mxu3 %v3722_v10  ;;  %3024 = vmatpush.bf16.msrb.mxu0 %v4614_v20  ;;  %v4915_v10 = vld [vmem:[%s5423_s24 + $0x22c] sm:$0xf]  ;;  %v4263_v20 = vld [vmem:[%s5423_s24 + $0x458] sm:$0xf0] }
 0x190   : > { %v3994_v18 = vor.u32 %v4915_v10, %v3991_v11  ;;  %v2741_v0 = vadd.f32 %v5856_v19, %v2728_v49  ;;  %v5011_v19 = vld [vmem:[%s5423_s24 + $0x52c] sm:$0xf]  ;;  %v4375_v11 = vld [vmem:[%s5423_s24 + $0x538] sm:$0xf0] }
 0x191   : > { %3057 = vmatpush.bf16.msra.mxu2 %v4074_v2  ;;  %3049 = vmatpush.bf16.msra.mxu1 %v3866_v28  ;;  %v4298_v2 = vor.u32 %v4991_v53, %v4295_v55  ;;  %v4951_v28 = vld [vmem:[%s5423_s24 + $0x34c] sm:$0xf] }
 0x192   : > { %3038 = vmatmul.bf16.vlgmr.msra.gmra.mxu3 %v5578_v13  ;;  %3025 = vmatmul.bf16.vlgmr.msrb.gmra.mxu0 %v5722_v4  ;;  %v4314_v13 = vor.u32 %v4995_v36, %v4311_v39  ;;  %v3978_v39 = vor.u32 %v4911_v26, %v3975_v27  ;;  %v4138_v46 = vor.u32 %v4951_v28, %v4135_v31  ;;  %v4975_v55 = vld [vmem:[%s5423_s24 + $0x40c] sm:$0xf]  ;;  %v4535_v31 = vld [vmem:[%s5423_s24 + $0x678] sm:$0xf0] }
 0x193   : > { %3082 = vmatpush.bf16.msrb.mxu3 %v4346_v16  ;;  %3069 = vmatpush.bf16.msra.mxu0 %v4218_v25  ;;  %v4282_v16 = vor.u32 %v4987_v41, %v4279_v6  ;;  %v4154_v25 = vor.u32 %v4955_v12, %v4151_v56  ;;  %v5059_v41 = vld [vmem:[%s5423_s24 + $0x6ac] sm:$0xf]  ;;  %v4234_v6 = vor.u32 %v4975_v55, %v4231_v57 }
 0x194   : > { %v2754_v10 = vadd.f32 %v5905_v35, %v2741_v0  ;;  %v5095_v35 = vld [vmem:[%s5423_s24 + $0x7cc] sm:$0xf] }
 0x195   : > { %3058 = vmatpush.bf16.msra.mxu2 %v4058_v21  ;;  %3050 = vmatpush.bf16.msra.mxu1 %v3850_v48  ;;  %v5023_v21 = vld [vmem:[%s5423_s24 + $0x58c] sm:$0xf]  ;;  %v5981_v24 = vpop.f32.mrf.mxu3  ;;  %v5986_v30 = vpop.f32.mrf.mxu1 }
 0x196   : > { %v4426_v36 = vor.u32 %v5023_v21, %v4423_v23  ;;  %v4947_v48 = vld [vmem:[%s5423_s24 + $0x32c] sm:$0xf]  ;;  %v4359_v21 = vld [vmem:[%s5423_s24 + $0x518] sm:$0xf0] }
 0x197   : > { %3083 = vmatpush.bf16.msrb.mxu3 %v4330_v32  ;;  %3070 = vmatpush.bf16.msra.mxu0 %v4202_v45  ;;  %v5067_v32 = vld [vmem:[%s5423_s24 + $0x6ec] sm:$0xf]  ;;  %v4407_v45 = vld [vmem:[%s5423_s24 + $0x578] sm:$0xf0]  ;;  %v4122_v61 = vor.u32 %v4947_v48, %v4119_v51 }
 0x198   : > { %3051 = vmatmul.bf16.vlgmr.msra.gmra.mxu1 %v5595_v40  ;;  %v4983_v40 = vld [vmem:[%s5423_s24 + $0x44c] sm:$0xf]  ;;  %v4602_v47 = vor.u32 %v5067_v32, %v4599_v33 }
 0x199   : > { %3059 = vmatpush.bf16.msra.mxu2 %v4042_v38  ;;  %3095 = vmatpush.bf16.msrb.mxu1 %v4474_v52  ;;  %v4266_v34 = vor.u32 %v4983_v40, %v4263_v20  ;;  %v4979_v38 = vld [vmem:[%s5423_s24 + $0x42c] sm:$0xf]  ;;  %v4583_v52 = vld [vmem:[%s5423_s24 + $0x6d8] sm:$0xf0] }
 0x19a   : > { %v4250_v53 = vor.u32 %v4979_v38, %v4247_v43  ;;  %v4711_v40 = vld [vmem:[%s5423_s24 + $0x7d8] sm:$0xf0]  ;;  %v5007_v20 = vld [vmem:[%s5423_s24 + $0x50c] sm:$0xf] }
 0x19b   : > { %3084 = vmatpush.bf16.msrb.mxu3 %v4314_v13  ;;  %3071 = vmatpush.bf16.msra.mxu0 %v4186_v59  ;;  %v5063_v13 = vld [vmem:[%s5423_s24 + $0x6cc] sm:$0xf]  ;;  %v4391_v59 = vld [vmem:[%s5423_s24 + $0x558] sm:$0xf0]  ;;  %v4714_v28 = vor.u32 %v5095_v35, %v4711_v40  ;;  %v4362_v32 = vor.u32 %v5007_v20, %v4359_v21 }
 0x19c   : > { %v4586_v62 = vor.u32 %v5063_v13, %v4583_v52  ;;  %v4394_v7 = vor.u32 %v5015_v58, %v4391_v59  ;;  %v5091_v33 = vld [vmem:[%s5423_s24 + $0x7ac] sm:$0xf]  ;;  %v4503_v52 = vld [vmem:[%s5423_s24 + $0x638] sm:$0xf0] }
 0x19d   : > { %3060 = vmatpush.bf16.msra.mxu2 %v4026_v54  ;;  %3096 = vmatpush.bf16.msrb.mxu1 %v4458_v3  ;;  %v4410_v54 = vor.u32 %v5019_v44, %v4407_v45  ;;  %v2781_v14 = vpop.f32.mrf.mxu3  ;;  %v4103_v3 = vld [vmem:[%s5423_s24 + $0x318] sm:$0xf0]  ;;  %v5047_v38 = vld [vmem:[%s5423_s24 + $0x64c] sm:$0xf] }
 0x19e   : > { %v4106_v12 = vor.u32 %v4943_v63, %v4103_v3  ;;  %v5087_v44 = vld [vmem:[%s5423_s24 + $0x78c] sm:$0xf]  ;;  %v4679_v45 = vld [vmem:[%s5423_s24 + $0x798] sm:$0xf0] }
 0x19f   : > { %3085 = vmatpush.bf16.msrb.mxu3 %v4298_v2  ;;  %3072 = vmatpush.bf16.msra.mxu0 %v4170_v9  ;;  %v2794_v2 = vpop.f32.mrf.mxu1  ;;  %v4727_v9 = vld [vmem:[%s5423_s24 + $0x7f8] sm:$0xf0]  ;;  %v4682_v51 = vor.u32 %v5087_v44, %v4679_v45  ;;  %v5043_v13 = vld [vmem:[%s5423_s24 + $0x62c] sm:$0xf] }
 0x1a0   : > { %v4730_v15 = vor.u32 %v5099_v8, %v4727_v9  ;;  %v4506_v55 = vor.u32 %v5043_v13, %v4503_v52  ;;  %v5039_v58 = vld [vmem:[%s5423_s24 + $0x60c] sm:$0xf]  ;;  %v4487_v59 = vld [vmem:[%s5423_s24 + $0x618] sm:$0xf0] }
 0x1a1   : > { %3061 = vmatpush.bf16.msra.mxu2 %v4010_v5  ;;  %3097 = vmatpush.bf16.msrb.mxu1 %v4442_v17  ;;  %v4567_v5 = vld [vmem:[%s5423_s24 + $0x6b8] sm:$0xf0]  ;;  %v5079_v14 = vld [vmem:[%s5423_s24 + $0x74c] sm:$0xf]  ;;  %v4490_v2 = vor.u32 %v5039_v58, %v4487_v59 }
 0x1a2   : > { %v4570_v56 = vor.u32 %v5059_v41, %v4567_v5  ;;  %v4551_v17 = vld [vmem:[%s5423_s24 + $0x698] sm:$0xf0]  ;;  %v5075_v5 = vld [vmem:[%s5423_s24 + $0x72c] sm:$0xf] }
 0x1a3   : > { %3086 = vmatpush.bf16.msrb.mxu3 %v4282_v16  ;;  %3073 = vmatpush.bf16.msra.mxu0 %v4154_v25  ;;  %v5055_v16 = vld [vmem:[%s5423_s24 + $0x68c] sm:$0xf] }
 0x1a4   : > { %v4554_v25 = vor.u32 %v5055_v16, %v4551_v17 }
 0x1a5   : > { %3062 = vmatpush.bf16.msra.mxu2 %v3994_v18  ;;  %3098 = vmatpush.bf16.msrb.mxu1 %v4426_v36  ;;  %v2767_v18 = vadd.f32 %v5910_v42, %v2754_v10  ;;  %v6029_v23 = vpop.f32.mrf.mxu3  ;;  %v5051_v42 = vld [vmem:[%s5423_s24 + $0x66c] sm:$0xf] }
 0x1a6   : > { %v5071_v10 = vld [vmem:[%s5423_s24 + $0x70c] sm:$0xf] }
 0x1a7   : > { %3087 = vmatpush.bf16.msrb.mxu3 %v4266_v34  ;;  %3074 = vmatpush.bf16.msra.mxu0 %v4138_v46  ;;  %v2780_v26 = vadd.f32 %v5981_v24, %v2767_v18  ;;  %v6033_v27 = vpop.f32.mrf.mxu1  ;;  %v4695_v34 = vld [vmem:[%s5423_s24 + $0x7b8] sm:$0xf0] }
 0x1a8   : > { %v4698_v36 = vor.u32 %v5091_v33, %v4695_v34 }
 0x1a9   : > { %3063 = vmatpush.bf16.msra.mxu2 %v3978_v39  ;;  %3099 = vmatpush.bf16.msrb.mxu1 %v4410_v54  ;;  %v2793_v24 = vadd.f32 %v5986_v30, %v2780_v26  ;;  %v4519_v39 = vld [vmem:[%s5423_s24 + $0x658] sm:$0xf0] }
 0x1aa   : > { %v4522_v30 = vor.u32 %v5047_v38, %v4519_v39  ;;  %v4663_v54 = vld [vmem:[%s5423_s24 + $0x778] sm:$0xf0] }
 0x1ab   : > { %3088 = vmatpush.bf16.msrb.mxu3 %v4250_v53  ;;  %3075 = vmatpush.bf16.msra.mxu0 %v4122_v61  ;;  %v5083_v53 = vld [vmem:[%s5423_s24 + $0x76c] sm:$0xf]  ;;  %v4647_v61 = vld [vmem:[%s5423_s24 + $0x758] sm:$0xf0] }
 0x1ac   : > { %3064 = vmatmul.bf16.vlgmr.msra.gmra.mxu2 %v5624_v22  ;;  %v4378_v22 = vor.u32 %v5011_v19, %v4375_v11  ;;  %v4666_v57 = vor.u32 %v5083_v53, %v4663_v54  ;;  %v4650_v3 = vor.u32 %v5079_v14, %v4647_v61  ;;  %v4615_v19 = vld [vmem:[%s5423_s24 + $0x718] sm:$0xf0]  ;;  %v1433_v61 = vperm.slane %v5965_v1, 3 }
 0x1ad   : > { %3108 = vmatpush.bf16.msrb.mxu2 %v4602_v47  ;;  %3100 = vmatpush.bf16.msrb.mxu1 %v4394_v7  ;;  %v2833_v47 = vpop.f32.mrf.mxu3  ;;  %v4618_v16 = vor.u32 %v5071_v10, %v4615_v19 }
 0x1af   : > { %3089 = vmatpush.bf16.msrb.mxu3 %v4234_v6  ;;  %3076 = vmatpush.bf16.msra.mxu0 %v4106_v12  ;;  %v2805_v43 = vpop.f32.mrf.mxu2  ;;  %v2846_v49 = vpop.f32.mrf.mxu1  ;;  %v4631_v6 = vld [vmem:[%s5423_s24 + $0x738] sm:$0xf0] }
 0x1b0   : > { %v2806_v46 = vadd.f32 %v2805_v43, %v2793_v24  ;;  %v4634_v8 = vor.u32 %v5075_v5, %v4631_v6 }
 0x1b1   : > { %3109 = vmatpush.bf16.msrb.mxu2 %v4586_v62  ;;  %3101 = vmatpush.bf16.msrb.mxu1 %v4378_v22  ;;  %v1431_v62 = vperm.slane %v5965_v1, 1 }
 0x1b2   : > { %3090 = vmatmul.bf16.vlgmr.msrb.gmra.mxu3 %v5668_v37  ;;  %3077 = vmatmul.bf16.vlgmr.msra.gmra.mxu0 %v5639_v50  ;;  %v4538_v37 = vor.u32 %v5051_v42, %v4535_v31  ;;  %v2818_v50 = vpop.f32.mrf.mxu0 }
 0x1b3   : > { %3121 = vmatpush.bf16.msrb.mxu0 %v4730_v15  ;;  %v2819_v48 = vadd.f32 %v2818_v50, %v2806_v46  ;;  %v2832_v7 = vadd.f32 %v6029_v23, %v1431_v62 }
 0x1b5   : > { %3110 = vmatpush.bf16.msrb.mxu2 %v4570_v56  ;;  %3102 = vmatpush.bf16.msrb.mxu1 %v4362_v32  ;;  %3134 = vst [vmem:[%s6052_s8] sm:$0xff] %v2819_v48  ;;  %v2883_v63 = vpop.f32.mrf.mxu3  ;;  %v2845_v11 = vadd.f32 %v6033_v27, %v2832_v7 }
 0x1b7   : > { %3122 = vmatpush.bf16.msrb.mxu0 %v4714_v28  ;;  %v2896_v41 = vpop.f32.mrf.mxu1 }
 0x1b8   : > { %3103 = vmatmul.bf16.vlgmr.msrb.gmra.mxu1 %v5679_v60  ;;  %v2807_v60 = vpop.f32.mrf.mxu2 }
 0x1b9   : > { %3111 = vmatpush.bf16.msrb.mxu2 %v4554_v25 }
 0x1ba   : > { %v2820_v0 = vpop.f32.mrf.mxu0 }
 0x1bb   : > { %3123 = vmatpush.bf16.msrb.mxu0 %v4698_v36 }
 0x1bd   : > { %3112 = vmatpush.bf16.msrb.mxu2 %v4538_v37  ;;  %v2885_v12 = vpop.f32.mrf.mxu3 }
 0x1bf   : > { %3124 = vmatpush.bf16.msrb.mxu0 %v4682_v51  ;;  %v2898_v17 = vpop.f32.mrf.mxu1 }
 0x1c0   : > { %v2857_v9 = vpop.f32.mrf.mxu2 }
 0x1c1   : > { %3113 = vmatpush.bf16.msrb.mxu2 %v4522_v30  ;;  %v2858_v15 = vadd.f32 %v2857_v9, %v2845_v11 }
 0x1c2   : > { %v2870_v56 = vpop.f32.mrf.mxu0 }
 0x1c3   : > { %3125 = vmatpush.bf16.msrb.mxu0 %v4666_v57  ;;  %v2871_v22 = vadd.f32 %v2870_v56, %v2858_v15 }
 0x1c5   : > { %3114 = vmatpush.bf16.msrb.mxu2 %v4506_v55  ;;  %v2884_v18 = vadd.f32 %v2883_v63, %v2871_v22 }
 0x1c7   : > { %3126 = vmatpush.bf16.msrb.mxu0 %v4650_v3  ;;  %v2897_v20 = vadd.f32 %v2896_v41, %v2884_v18 }
 0x1c8   : > { %v2859_v35 = vpop.f32.mrf.mxu2 }
 0x1c9   : > { %3115 = vmatpush.bf16.msrb.mxu2 %v4490_v2 }
 0x1ca   : > { %v2872_v40 = vpop.f32.mrf.mxu0 }
 0x1cb   : > { %3127 = vmatpush.bf16.msrb.mxu0 %v4634_v8 }
 0x1cc   : > { %3116 = vmatmul.bf16.vlgmr.msrb.gmra.mxu2 %v5701_v29 }
 0x1cf   : > { %3128 = vmatpush.bf16.msrb.mxu0 %v4618_v16 }
 0x1d0   : > { %v2909_v21 = vpop.f32.mrf.mxu2 }
 0x1d1   : > { %v2910_v23 = vadd.f32 %v2909_v21, %v2897_v20 }
 0x1d2   : > { %3129 = vmatmul.bf16.vlgmr.msrb.gmra.mxu0 %v5722_v4  ;;  %v2922_v25 = vpop.f32.mrf.mxu0  ;;  %v1432_v4 = vperm.slane %v5965_v1, 2 }
 0x1d3   : > { %v2923_v26 = vadd.f32 %v2922_v25, %v2910_v23 }
 0x1d5   : > { %3135 = vst [vmem:[%s6052_s8 + $0x8] sm:$0xff] %v2923_v26  ;;  %v2935_v29 = vpop.f32.mrf.mxu3  ;;  %v2948_v27 = vpop.f32.mrf.mxu1 }
 0x1d6   : > { %v2936_v39 = vadd.f32 %v2935_v29, %v1432_v4 }
 0x1d8   : > { %v2911_v28 = vpop.f32.mrf.mxu2  ;;  %v2949_v44 = vadd.f32 %v2948_v27, %v2936_v39 }
 0x1da   : > { %v2924_v42 = vpop.f32.mrf.mxu0 }
 0x1dd   : > { %v2937_v31 = vpop.f32.mrf.mxu3  ;;  %v2950_v32 = vpop.f32.mrf.mxu1 }
 0x1ef   : > { %v2961_v33 = vpop.f32.mrf.mxu2  ;;  %v2974_v34 = vpop.f32.mrf.mxu0 }
 0x1f0   : > { %v2962_v46 = vadd.f32 %v2961_v33, %v2949_v44 }
 0x1f2   : > { %v2975_v47 = vadd.f32 %v2974_v34, %v2962_v46 }
 0x1f5   : > { %v2987_v37 = vpop.f32.mrf.mxu3  ;;  %v3000_v36 = vpop.f32.mrf.mxu1 }
 0x1f6   : > { %v2988_v50 = vadd.f32 %v2987_v37, %v2975_v47 }
 0x1f7   : > { %v2963_v24 = vpop.f32.mrf.mxu2  ;;  %v2976_v38 = vpop.f32.mrf.mxu0 }
 0x1f8   : > { %v3001_v30 = vadd.f32 %v3000_v36, %v2988_v50 }
 0x1fd   : > { %v2989_v43 = vpop.f32.mrf.mxu3  ;;  %v3002_v45 = vpop.f32.mrf.mxu1 }
 0x20f   : > { %v3013_v48 = vpop.f32.mrf.mxu2  ;;  %v3026_v51 = vpop.f32.mrf.mxu0 }
 0x210   : > { %v3014_v49 = vadd.f32 %v3013_v48, %v3001_v30 }
 0x212   : > { %v3027_v13 = vadd.f32 %v3026_v51, %v3014_v49 }
 0x214   : > { %3136 = vst [vmem:[%s6052_s8 + $0x10] sm:$0xff] %v3027_v13 }
 0x215   : > { %v3039_v52 = vpop.f32.mrf.mxu3  ;;  %v3052_v54 = vpop.f32.mrf.mxu1 }
 0x216   : > { %v3040_v2 = vadd.f32 %v3039_v52, %v1433_v61 }
 0x217   : > { %v3015_v53 = vpop.f32.mrf.mxu2  ;;  %v3028_v55 = vpop.f32.mrf.mxu0 }
 0x218   : > { %v3053_v41 = vadd.f32 %v3052_v54, %v3040_v2 }
 0x21d   : > { %v3041_v57 = vpop.f32.mrf.mxu3  ;;  %v3054_v58 = vpop.f32.mrf.mxu1 }
 0x22f   : > { %v3065_v59 = vpop.f32.mrf.mxu2  ;;  %v3078_v60 = vpop.f32.mrf.mxu0 }
 0x230   : > { %v3066_v6 = vadd.f32 %v3065_v59, %v3053_v41 }
 0x232   : > { %v3079_v7 = vadd.f32 %v3078_v60, %v3066_v6 }
 0x235   : > { %v3091_v14 = vpop.f32.mrf.mxu3  ;;  %v3104_v63 = vpop.f32.mrf.mxu1 }
 0x236   : > { %v3092_v8 = vadd.f32 %v3091_v14, %v3079_v7 }
 0x237   : > { %v3067_v62 = vpop.f32.mrf.mxu2  ;;  %v3080_v0 = vpop.f32.mrf.mxu0 }
 0x238   : > { %v3105_v9 = vadd.f32 %v3104_v63, %v3092_v8 }
 0x23d   : > { %v3093_v3 = vpop.f32.mrf.mxu3  ;;  %v3106_v5 = vpop.f32.mrf.mxu1 }
 0x24f   : > { %v3117_v10 = vpop.f32.mrf.mxu2  ;;  %v3130_v11 = vpop.f32.mrf.mxu0 }
 0x250   : > { %v3118_v19 = vadd.f32 %v3117_v10, %v3105_v9 }
 0x252   : > { %v3131_v12 = vadd.f32 %v3130_v11, %v3118_v19 }
 0x254   : > { %3137 = vst [vmem:[%s6052_s8 + $0x18] sm:$0xff] %v3131_v12 }
 0x257   : > { %v3119_v56 = vpop.f32.mrf.mxu2  ;;  %v3132_v15 = vpop.f32.mrf.mxu0 }
 0x258 PF: > { %p15_p8 = scmp.ge.s32.totalorder %s5353_s20, 4   ;;  %s6101_s15 = smov %s5290_s16 }
 0x259   : > { %s6102_s16 = smov %s5294_s17  ;;  %s6103_s17 = smov %s5363_s23 }
 0x25a   : > { %s6104_s18 = smov %s5353_s20  ;;  %17 = sbr.rel (!%p15_p8) target bundleno = 4 (0x4), region = 86 }
 0x25f   :  { %3160 = vsyncpa [#allocation3], 1 }
 0x260   :  { %3162 = vsyncpa [#allocation3 + $0x1], 1 }
 0x261   :  { %3163 = vsyncpa [#allocation5], 1 }
 0x262   :  { %3165 = vsyncpa [#allocation5 + $0x1], 1 }

</bundles_post_ra>
